<compile_context>
chip_gen: v7x
topology: tpu7x:2x2x1
jax: 0.10.0
libtpu: 0.0.40
codegen_flags: <defaults>
</compile_context>

<pallas_src>
import jax
import jax.numpy as jnp
import numpy as np
from jax.experimental import pallas as pl
from jax.experimental.pallas import tpu as pltpu

EPS = 1e-5
LANE = 128
MXU_DTYPE = jnp.bfloat16            # matmul operand dtype (accumulation is f32)
VMEM_LIMIT_BYTES = 32 * 1024 * 1024


# --------------------------- small host helpers ------------------------------

def _round_up(x, m):
    return (x + m - 1) // m * m


def _pad_last(x, target):
    c = x.shape[-1]
    if c == target:
        return x
    pad = [(0, 0)] * (x.ndim - 1) + [(0, target - c)]
    return jnp.pad(x, pad)


def _compiler_params():
    return pltpu.CompilerParams(
        dimension_semantics=("parallel",),
        vmem_limit_bytes=VMEM_LIMIT_BYTES,
    )


def _conv_weight_taps(w, cpin, cpout):
    """[Cout, Cin, 3, 3] -> [9, cpin, cpout], zero-padded, cast to MXU dtype."""
    cout, cin, kh, kw = w.shape
    taps = jnp.transpose(w, (2, 3, 1, 0)).reshape(kh * kw, cin, cout)
    taps = jnp.pad(taps, ((0, 0), (0, cpin - cin), (0, cpout - cout)))
    return taps.astype(MXU_DTYPE)


def _conv_phases(xp, stride):
    """Phase decomposition of a spatially padded NHWC tensor for a 3x3/stride-s conv.

    Returns s*s non-overlapping phase views (together exactly 1x the padded
    input: no im2col blow-up) plus, per tap, (phase index, row off, col off)
    so the in-kernel tap read is a plain unit-stride static slice.
    """
    s = stride
    phases = [xp[:, i::s, j::s, :] for i in range(s) for j in range(s)]
    tap_meta = [((kh % s) * s + (kw % s), kh // s, kw // s)
                for kh in range(3) for kw in range(3)]
    return phases, tap_meta


def _bn_fold(part_sum, part_sq, count, gamma_p, beta_p):
    """Combine per-grid-step partial sums into per-channel BN (scale, shift).

    y_norm = y * scale + shift  with  scale = gamma*rstd, shift = beta - mean*scale.
    Padded channels have gamma = beta = 0, so they stay exactly zero.
    """
    s = jnp.sum(part_sum, axis=0)                       # [1, Cp]
    q = jnp.sum(part_sq, axis=0)
    mean = s / count
    var = q / count - mean * mean
    rstd = jax.lax.rsqrt(var + EPS)
    scale = rstd * gamma_p
    shift = beta_p - mean * scale
    return scale, shift


# --------------------------- Pallas kernels ----------------------------------

def _make_conv_stats_kernel(n_phase, tap_meta, ho, wo, cpout):
    """3x3 conv (stride folded into phases) -> pre-BN activations + partial stats."""

    def kernel(*refs):
        phase_refs = refs[:n_phase]
        w_ref = refs[n_phase]
        y_ref, sum_ref, sq_ref = refs[n_phase + 1:n_phase + 4]

        acc = jnp.zeros((ho * wo, cpout), jnp.float32)
        for t, (p, r0, c0) in enumerate(tap_meta):
            slab = phase_refs[p][0, r0:r0 + ho, c0:c0 + wo, :]
            slab = slab.reshape(ho * wo, slab.shape[-1]).astype(MXU_DTYPE)
            acc = acc + jnp.dot(slab, w_ref[t], preferred_element_type=jnp.float32)

        y_ref[0] = acc
        sum_ref[0] = jnp.sum(acc, axis=0, keepdims=True)
        sq_ref[0] = jnp.sum(acc * acc, axis=0, keepdims=True)

    return kernel


def _make_body2_kernel(ho, wo, cpout, with_shortcut):
    """BN1 (in-kernel) -> 3x3 stride-1 conv -> partial stats; optional 1x1 shortcut."""

    def kernel(*refs):
        if with_shortcut:
            (y1_ref, sc1_ref, sh1_ref, w2_ref, xs_ref, wd_ref,
             y2_ref, s2_ref, q2_ref, rs_ref, sd_ref, qd_ref, pad_ref) = refs
        else:
            (y1_ref, sc1_ref, sh1_ref, w2_ref,
             y2_ref, s2_ref, q2_ref, pad_ref) = refs

        # BN1 with exact global batch statistics (single fused scale/shift).
        y1n = y1_ref[0] * sc1_ref[...] + sh1_ref[...]

        # Zero-padded spatial tile for conv2 (padding applies to the BN output,
        # as in the reference).
        pad_ref[...] = jnp.zeros_like(pad_ref)
        pad_ref[1:ho + 1, 1:wo + 1, :] = y1n.reshape(ho, wo, cpout)

        acc = jnp.zeros((ho * wo, cpout), jnp.float32)
        for t in range(9):
            kh, kw = t // 3, t % 3
            slab = pad_ref[kh:kh + ho, kw:kw + wo, :]
            slab = slab.reshape(ho * wo, cpout).astype(MXU_DTYPE)
            acc = acc + jnp.dot(slab, w2_ref[t], preferred_element_type=jnp.float32)

        y2_ref[0] = acc
        s2_ref[0] = jnp.sum(acc, axis=0, keepdims=True)
        q2_ref[0] = jnp.sum(acc * acc, axis=0, keepdims=True)

        if with_shortcut:
            r = jnp.dot(xs_ref[0], wd_ref[...], preferred_element_type=jnp.float32)
            rs_ref[0] = r
            sd_ref[0] = jnp.sum(r, axis=0, keepdims=True)
            qd_ref[0] = jnp.sum(r * r, axis=0, keepdims=True)

    return kernel


def _make_finalize_kernel(with_shortcut):
    """BN2 (+ BN_downsample) + residual add — lane-dense elementwise epilogue."""

    def kernel(*refs):
        if with_shortcut:
            (y2_ref, sc2_ref, sh2_ref, rs_ref, scd_ref, shd_ref, o_ref) = refs
            o_ref[0] = (y2_ref[0] * sc2_ref[...] + sh2_ref[...]
                        + rs_ref[0] * scd_ref[...] + shd_ref[...])
        else:
            (y2_ref, sc2_ref, sh2_ref, x_ref, o_ref) = refs
            o_ref[0] = y2_ref[0] * sc2_ref[...] + sh2_ref[...] + x_ref[0]

    return kernel


# --------------------------- pallas_call wrappers -----------------------------

def _conv1_call(phases, tap_meta, w_taps, ho, wo):
    n = phases[0].shape[0]
    cpin = phases[0].shape[-1]
    cpout = w_taps.shape[-1]

    in_specs = [pl.BlockSpec((1,) + p.shape[1:], lambda i: (i, 0, 0, 0)) for p in phases]
    in_specs.append(pl.BlockSpec(w_taps.shape, lambda i: (0, 0, 0)))

    big = pl.BlockSpec((1, ho * wo, cpout), lambda i: (i, 0, 0))
    vec = pl.BlockSpec((1, 1, cpout), lambda i: (i, 0, 0))

    flops = 2 * n * ho * wo * 9 * cpin * cpout
    bytes_accessed = int(sum(p.size * p.dtype.itemsize for p in phases)
                         + w_taps.size * w_taps.dtype.itemsize
                         + n * ho * wo * cpout * 4 + 2 * n * cpout * 4)

    return pl.pallas_call(
        _make_conv_stats_kernel(len(phases), tap_meta, ho, wo, cpout),
        grid=(n,),
        in_specs=in_specs,
        out_specs=(big, vec, vec),
        out_shape=(
            jax.ShapeDtypeStruct((n, ho * wo, cpout), jnp.float32),
            jax.ShapeDtypeStruct((n, 1, cpout), jnp.float32),
            jax.ShapeDtypeStruct((n, 1, cpout), jnp.float32),
        ),
        compiler_params=_compiler_params(),
        cost_estimate=pl.CostEstimate(flops=flops, transcendentals=0,
                                      bytes_accessed=bytes_accessed),
    )(*phases, w_taps)


def _body2_call(y1_pre, scale1, shift1, w2_taps, xs, wd_mat, ho, wo):
    n, _, cpout = y1_pre.shape
    with_shortcut = xs is not None

    big = pl.BlockSpec((1, ho * wo, cpout), lambda i: (i, 0, 0))
    vec = pl.BlockSpec((1, 1, cpout), lambda i: (i, 0, 0))
    chan = pl.BlockSpec((1, cpout), lambda i: (0, 0))

    in_specs = [big, chan, chan,
                pl.BlockSpec(w2_taps.shape, lambda i: (0, 0, 0))]
    args = [y1_pre, scale1, shift1, w2_taps]
    out_specs = [big, vec, vec]
    out_shape = [jax.ShapeDtypeStruct((n, ho * wo, cpout), jnp.float32),
                 jax.ShapeDtypeStruct((n, 1, cpout), jnp.float32),
                 jax.ShapeDtypeStruct((n, 1, cpout), jnp.float32)]

    flops = 2 * n * ho * wo * 9 * cpout * cpout
    bytes_accessed = int(2 * y1_pre.size * 4
                         + w2_taps.size * w2_taps.dtype.itemsize
                         + 2 * cpout * 4 + 4 * n * cpout * 4)

    if with_shortcut:
        cpin = xs.shape[-1]
        in_specs += [pl.BlockSpec((1, ho * wo, cpin), lambda i: (i, 0, 0)),
                     pl.BlockSpec(wd_mat.shape, lambda i: (0, 0))]
        args += [xs, wd_mat]
        out_specs += [big, vec, vec]
        out_shape += [jax.ShapeDtypeStruct((n, ho * wo, cpout), jnp.float32),
                      jax.ShapeDtypeStruct((n, 1, cpout), jnp.float32),
                      jax.ShapeDtypeStruct((n, 1, cpout), jnp.float32)]
        flops += 2 * n * ho * wo * cpin * cpout
        bytes_accessed += int(xs.size * xs.dtype.itemsize
                              + wd_mat.size * wd_mat.dtype.itemsize
                              + n * ho * wo * cpout * 4 + 2 * n * cpout * 4)

    return pl.pallas_call(
        _make_body2_kernel(ho, wo, cpout, with_shortcut),
        grid=(n,),
        in_specs=in_specs,
        out_specs=tuple(out_specs),
        out_shape=tuple(out_shape),
        scratch_shapes=[pltpu.VMEM((ho + 2, wo + 2, cpout), jnp.float32)],
        compiler_params=_compiler_params(),
        cost_estimate=pl.CostEstimate(flops=flops, transcendentals=0,
                                      bytes_accessed=bytes_accessed),
    )(*args)


def _finalize_call(y2_pre, scale2, shift2, resid, scaled=None, shiftd=None):
    n, rows, cpout = y2_pre.shape
    with_shortcut = scaled is not None

    big = pl.BlockSpec((1, rows, cpout), lambda i: (i, 0, 0))
    chan = pl.BlockSpec((1, cpout), lambda i: (0, 0))

    if with_shortcut:
        in_specs = [big, chan, chan, big, chan, chan]
        args = [y2_pre, scale2, shift2, resid, scaled, shiftd]
    else:
        in_specs = [big, chan, chan,
                    pl.BlockSpec((1, rows, resid.shape[-1]), lambda i: (i, 0, 0))]
        args = [y2_pre, scale2, shift2, resid]

    return pl.pallas_call(
        _make_finalize_kernel(with_shortcut),
        grid=(n,),
        in_specs=in_specs,
        out_specs=pl.BlockSpec((1, rows, cpout), lambda i: (i, 0, 0)),
        out_shape=jax.ShapeDtypeStruct((n, rows, cpout), jnp.float32),
        compiler_params=_compiler_params(),
    )(*args)


# --------------------------- forward ------------------------------------------

def basic_block_forward(x_nchw, params, stride):
    (w1, g1, b1, w2, g2, b2, wd, gd, bd) = params
    n, cin, h, w = x_nchw.shape
    cout = w1.shape[0]
    downsample = cin != cout
    s = (2 if downsample else 1) if stride == -1 else stride

    cpin = _round_up(cin, LANE)
    cpout = _round_up(cout, LANE)
    ho = (h - 1) // s + 1          # = (h + 2*1 - 3) // s + 1
    wo = (w - 1) // s + 1
    m = n * ho * wo

    # PyTorch boundary is NCHW; an NHWC caller would avoid these two transposes.
    x = jnp.transpose(x_nchw, (0, 2, 3, 1))
    x = _pad_last(x, cpin)

    # ---- conv1 (3x3, stride s) + BN1 partial statistics -----------------------
    # Phases go in as bf16 (MXU operand dtype anyway): halves conv1 input DMA.
    xp = jnp.pad(x, ((0, 0), (1, 1), (1, 1), (0, 0))).astype(MXU_DTYPE)
    phases, tap_meta = _conv_phases(xp, s)
    w1_t = _conv_weight_taps(w1, cpin, cpout)
    y1_pre, s1, q1 = _conv1_call(phases, tap_meta, w1_t, ho, wo)

    g1p = _pad_last(g1.reshape(1, -1), cpout)
    b1p = _pad_last(b1.reshape(1, -1), cpout)
    g2p = _pad_last(g2.reshape(1, -1), cpout)
    b2p = _pad_last(b2.reshape(1, -1), cpout)

    scale1, shift1 = _bn_fold(s1, q1, m, g1p, b1p)

    # ---- BN1 -> conv2 (3x3, stride 1) [+ fused 1x1 shortcut conv] -------------
    w2_t = _conv_weight_taps(w2, cpout, cpout)
    if downsample:
        xs = x[:, ::s, ::s, :].reshape(n, ho * wo, cpin).astype(MXU_DTYPE)
        wd_mat = jnp.pad(wd[:, :, 0, 0].T,
                         ((0, cpin - cin), (0, cpout - cout))).astype(MXU_DTYPE)
        y2_pre, s2, q2, r_pre, sd, qd = _body2_call(
            y1_pre, scale1, shift1, w2_t, xs, wd_mat, ho, wo)
    else:
        y2_pre, s2, q2 = _body2_call(
            y1_pre, scale1, shift1, w2_t, None, None, ho, wo)

    # ---- BN2 [+ BN_downsample] + residual add ----------------------------------
    scale2, shift2 = _bn_fold(s2, q2, m, g2p, b2p)
    if downsample:
        gdp = _pad_last(gd.reshape(1, -1), cpout)
        bdp = _pad_last(bd.reshape(1, -1), cpout)
        scaled, shiftd = _bn_fold(sd, qd, m, gdp, bdp)
        out = _finalize_call(y2_pre, scale2, shift2, r_pre, scaled, shiftd)
    else:
        resid = x.reshape(n, h * w, cpin)
        out = _finalize_call(y2_pre, scale2, shift2, resid)

    out = out[:, :, :cout].reshape(n, ho, wo, cout)
    return jnp.transpose(out, (0, 3, 1, 2))              # NCHW


# --------------------------- pure-JAX reference --------------------------------

def _ref_forward(x, params, stride):
    (w1, g1, b1, w2, g2, b2, wd, gd, bd) = params
    cin = x.shape[1]
    cout = w1.shape[0]
    downsample = cin != cout
    s = (2 if downsample else 1) if stride == -1 else stride

    def conv(v, wt, st, pad):
        return jax.lax.conv_general_dilated(
            v, wt, (st, st), [(pad, pad), (pad, pad)],
            dimension_numbers=("NCHW", "OIHW", "NCHW"))

    def bn(y, g, b):
        mu = y.mean(axis=(0, 2, 3), keepdims=True)
        var = jnp.square(y - mu).mean(axis=(0, 2, 3), keepdims=True)
        return (y - mu) * jax.lax.rsqrt(var + EPS) * g.reshape(1, -1, 1, 1) \
            + b.reshape(1, -1, 1, 1)

    y = bn(conv(x, w1, s, 1), g1, b1)
    y = bn(conv(y, w2, 1, 1), g2, b2)
    r = bn(conv(x, wd, s, 0), gd, bd) if downsample else x
    return y + r


# --------------------------- main -----------------------------------------------

if __name__ == "__main__":
    def make_params(key, cin, cout, downsample):
        ks = jax.random.split(key, 10)
        w1 = jax.random.normal(ks[1], (cout, cin, 3, 3), jnp.float32) * 0.1
        w2 = jax.random.normal(ks[2], (cout, cout, 3, 3), jnp.float32) * 0.1
        g1 = 1.0 + 0.1 * jax.random.normal(ks[4], (cout,), jnp.float32)
        b1 = 0.1 * jax.random.normal(ks[5], (cout,), jnp.float32)
        g2 = 1.0 + 0.1 * jax.random.normal(ks[6], (cout,), jnp.float32)
        b2 = 0.1 * jax.random.normal(ks[7], (cout,), jnp.float32)
        if downsample:
            wd = jax.random.normal(ks[3], (cout, cin, 1, 1), jnp.float32) * 0.1
            gd = 1.0 + 0.1 * jax.random.normal(ks[8], (cout,), jnp.float32)
            bd = 0.1 * jax.random.normal(ks[9], (cout,), jnp.float32)
        else:
            wd = gd = bd = None
        return (w1, g1, b1, w2, g2, b2, wd, gd, bd)

    key = jax.random.PRNGKey(0)
    k1, k2, kx1, kx2 = jax.random.split(key, 4)
    fwd = jax.jit(basic_block_forward, static_argnums=2)

    # Tolerance accounts for bf16 MXU operands vs. the float32 reference.
    RTOL = ATOL = 3e-2

    # Case 1: downsampling block (stride=-1 resolves to 2 since Cin != Cout).
    N, Cin, Cout, H, W = 2, 4, 8, 16, 16
    stride = 2
    x = jax.random.normal(kx1, (N, Cin, H, W), jnp.float32)
    params = make_params(k1, Cin, Cout, True)
    out = jax.block_until_ready(fwd(x, params, stride))
    ref = jax.block_until_ready(_ref_forward(x, params, stride))
    assert out.shape == (N, Cout, H // stride, W // stride), out.shape
    np.testing.assert_allclose(np.asarray(out), np.asarray(ref), rtol=RTOL, atol=ATOL)

    # Case 2: identity-shortcut block (stride=-1 resolves to 1 since Cin == Cout).
    N2, C2 = 2, 8
    x2 = jax.random.normal(kx2, (N2, C2, H, W), jnp.float32)
    params2 = make_params(k2, C2, C2, False)
    out2 = jax.block_until_ready(fwd(x2, params2, 1))
    ref2 = jax.block_until_ready(_ref_forward(x2, params2, 1))
    assert out2.shape == (N2, C2, H, W), out2.shape
    np.testing.assert_allclose(np.asarray(out2), np.asarray(ref2), rtol=RTOL, atol=ATOL)

    print("KERNEL_OK")
</pallas_src>

<mosaic_0001>
module attributes {stable_mosaic.version = 11 : i64} {
  func.func @kernel(%arg0: i32, %arg1: memref<1x9x9x128xbf16, #tpu.memory_space<vmem>>, %arg2: memref<1x9x9x128xbf16, #tpu.memory_space<vmem>>, %arg3: memref<1x9x9x128xbf16, #tpu.memory_space<vmem>>, %arg4: memref<1x9x9x128xbf16, #tpu.memory_space<vmem>>, %arg5: memref<9x128x128xbf16, #tpu.memory_space<vmem>>, %arg6: memref<1x64x128xf32, #tpu.memory_space<vmem>>, %arg7: memref<1x1x128xf32, #tpu.memory_space<vmem>>, %arg8: memref<1x1x128xf32, #tpu.memory_space<vmem>>) attributes {dimension_semantics = [#tpu.dimension_semantics<parallel>], iteration_bounds = array<i64: 2>, scalar_prefetch = 0 : i64, scratch_operands = 0 : i64, tpu.core_type = #tpu.core_type<tc>, window_params = [{transform_indices = @transform_0, window_bounds = array<i64: 1, 9, 9, 128>}, {transform_indices = @transform_1, window_bounds = array<i64: 1, 9, 9, 128>}, {transform_indices = @transform_2, window_bounds = array<i64: 1, 9, 9, 128>}, {transform_indices = @transform_3, window_bounds = array<i64: 1, 9, 9, 128>}, {pipeline_mode = #tpu.pipeline_mode<synchronous>, transform_indices = @transform_4, window_bounds = array<i64: 9, 128, 128>}, {transform_indices = @transform_5, window_bounds = array<i64: 1, 64, 128>}, {transform_indices = @transform_6, window_bounds = array<i64: 1, 1, 128>}, {transform_indices = @transform_7, window_bounds = array<i64: 1, 1, 128>}]} {
    %cst = arith.constant 0.000000e+00 : f32
    %0 = vector.broadcast %cst : f32 to vector<64x128xf32>
    %c0 = arith.constant 0 : index
    %c0_0 = arith.constant 0 : index
    %c0_1 = arith.constant 0 : index
    %c0_2 = arith.constant 0 : index
    %1 = vector.load %arg1[%c0, %c0_0, %c0_1, %c0_2] : memref<1x9x9x128xbf16, #tpu.memory_space<vmem>>, vector<1x8x8x128xbf16>
    %2 = vector.shape_cast %1 : vector<1x8x8x128xbf16> to vector<8x8x128xbf16>
    %3 = vector.shape_cast %2 : vector<8x8x128xbf16> to vector<64x128xbf16>
    %c0_3 = arith.constant 0 : index
    %c0_4 = arith.constant 0 : index
    %c0_5 = arith.constant 0 : index
    %4 = vector.load %arg5[%c0_3, %c0_4, %c0_5] : memref<9x128x128xbf16, #tpu.memory_space<vmem>>, vector<1x128x128xbf16>
    %5 = vector.shape_cast %4 : vector<1x128x128xbf16> to vector<128x128xbf16>
    %cst_6 = arith.constant dense<0.000000e+00> : vector<64x128xf32>
    %6 = tpu.matmul %3, %5, %cst_6 {dimension_numbers = #tpu.dot_dimension_numbers<[1], [0], [0], [1], [0, 0, 1, 1], [], []>} : vector<64x128xbf16>, vector<128x128xbf16>, vector<64x128xf32> -> vector<64x128xf32>
    %7 = arith.addf %0, %6 : vector<64x128xf32>
    %c0_7 = arith.constant 0 : index
    %c0_8 = arith.constant 0 : index
    %c0_9 = arith.constant 0 : index
    %c0_10 = arith.constant 0 : index
    %8 = vector.load %arg2[%c0_7, %c0_8, %c0_9, %c0_10] : memref<1x9x9x128xbf16, #tpu.memory_space<vmem>>, vector<1x8x8x128xbf16>
    %9 = vector.shape_cast %8 : vector<1x8x8x128xbf16> to vector<8x8x128xbf16>
    %10 = vector.shape_cast %9 : vector<8x8x128xbf16> to vector<64x128xbf16>
    %c1 = arith.constant 1 : index
    %c0_11 = arith.constant 0 : index
    %c0_12 = arith.constant 0 : index
    %11 = vector.load %arg5[%c1, %c0_11, %c0_12] : memref<9x128x128xbf16, #tpu.memory_space<vmem>>, vector<1x128x128xbf16>
    %12 = vector.shape_cast %11 : vector<1x128x128xbf16> to vector<128x128xbf16>
    %cst_13 = arith.constant dense<0.000000e+00> : vector<64x128xf32>
    %13 = tpu.matmul %10, %12, %cst_13 {dimension_numbers = #tpu.dot_dimension_numbers<[1], [0], [0], [1], [0, 0, 1, 1], [], []>} : vector<64x128xbf16>, vector<128x128xbf16>, vector<64x128xf32> -> vector<64x128xf32>
    %14 = arith.addf %7, %13 : vector<64x128xf32>
    %c0_14 = arith.constant 0 : index
    %c0_15 = arith.constant 0 : index
    %c1_16 = arith.constant 1 : index
    %c0_17 = arith.constant 0 : index
    %15 = vector.load %arg1[%c0_14, %c0_15, %c1_16, %c0_17] : memref<1x9x9x128xbf16, #tpu.memory_space<vmem>>, vector<1x8x8x128xbf16>
    %16 = vector.shape_cast %15 : vector<1x8x8x128xbf16> to vector<8x8x128xbf16>
    %17 = vector.shape_cast %16 : vector<8x8x128xbf16> to vector<64x128xbf16>
    %c2 = arith.constant 2 : index
    %c0_18 = arith.constant 0 : index
    %c0_19 = arith.constant 0 : index
    %18 = vector.load %arg5[%c2, %c0_18, %c0_19] : memref<9x128x128xbf16, #tpu.memory_space<vmem>>, vector<1x128x128xbf16>
    %19 = vector.shape_cast %18 : vector<1x128x128xbf16> to vector<128x128xbf16>
    %cst_20 = arith.constant dense<0.000000e+00> : vector<64x128xf32>
    %20 = tpu.matmul %17, %19, %cst_20 {dimension_numbers = #tpu.dot_dimension_numbers<[1], [0], [0], [1], [0, 0, 1, 1], [], []>} : vector<64x128xbf16>, vector<128x128xbf16>, vector<64x128xf32> -> vector<64x128xf32>
    %21 = arith.addf %14, %20 : vector<64x128xf32>
    %c0_21 = arith.constant 0 : index
    %c0_22 = arith.constant 0 : index
    %c0_23 = arith.constant 0 : index
    %c0_24 = arith.constant 0 : index
    %22 = vector.load %arg3[%c0_21, %c0_22, %c0_23, %c0_24] : memref<1x9x9x128xbf16, #tpu.memory_space<vmem>>, vector<1x8x8x128xbf16>
    %23 = vector.shape_cast %22 : vector<1x8x8x128xbf16> to vector<8x8x128xbf16>
    %24 = vector.shape_cast %23 : vector<8x8x128xbf16> to vector<64x128xbf16>
    %c3 = arith.constant 3 : index
    %c0_25 = arith.constant 0 : index
    %c0_26 = arith.constant 0 : index
    %25 = vector.load %arg5[%c3, %c0_25, %c0_26] : memref<9x128x128xbf16, #tpu.memory_space<vmem>>, vector<1x128x128xbf16>
    %26 = vector.shape_cast %25 : vector<1x128x128xbf16> to vector<128x128xbf16>
    %cst_27 = arith.constant dense<0.000000e+00> : vector<64x128xf32>
    %27 = tpu.matmul %24, %26, %cst_27 {dimension_numbers = #tpu.dot_dimension_numbers<[1], [0], [0], [1], [0, 0, 1, 1], [], []>} : vector<64x128xbf16>, vector<128x128xbf16>, vector<64x128xf32> -> vector<64x128xf32>
    %28 = arith.addf %21, %27 : vector<64x128xf32>
    %c0_28 = arith.constant 0 : index
    %c0_29 = arith.constant 0 : index
    %c0_30 = arith.constant 0 : index
    %c0_31 = arith.constant 0 : index
    %29 = vector.load %arg4[%c0_28, %c0_29, %c0_30, %c0_31] : memref<1x9x9x128xbf16, #tpu.memory_space<vmem>>, vector<1x8x8x128xbf16>
    %30 = vector.shape_cast %29 : vector<1x8x8x128xbf16> to vector<8x8x128xbf16>
    %31 = vector.shape_cast %30 : vector<8x8x128xbf16> to vector<64x128xbf16>
    %c4 = arith.constant 4 : index
    %c0_32 = arith.constant 0 : index
    %c0_33 = arith.constant 0 : index
    %32 = vector.load %arg5[%c4, %c0_32, %c0_33] : memref<9x128x128xbf16, #tpu.memory_space<vmem>>, vector<1x128x128xbf16>
    %33 = vector.shape_cast %32 : vector<1x128x128xbf16> to vector<128x128xbf16>
    %cst_34 = arith.constant dense<0.000000e+00> : vector<64x128xf32>
    %34 = tpu.matmul %31, %33, %cst_34 {dimension_numbers = #tpu.dot_dimension_numbers<[1], [0], [0], [1], [0, 0, 1, 1], [], []>} : vector<64x128xbf16>, vector<128x128xbf16>, vector<64x128xf32> -> vector<64x128xf32>
    %35 = arith.addf %28, %34 : vector<64x128xf32>
    %c0_35 = arith.constant 0 : index
    %c0_36 = arith.constant 0 : index
    %c1_37 = arith.constant 1 : index
    %c0_38 = arith.constant 0 : index
    %36 = vector.load %arg3[%c0_35, %c0_36, %c1_37, %c0_38] : memref<1x9x9x128xbf16, #tpu.memory_space<vmem>>, vector<1x8x8x128xbf16>
    %37 = vector.shape_cast %36 : vector<1x8x8x128xbf16> to vector<8x8x128xbf16>
    %38 = vector.shape_cast %37 : vector<8x8x128xbf16> to vector<64x128xbf16>
    %c5 = arith.constant 5 : index
    %c0_39 = arith.constant 0 : index
    %c0_40 = arith.constant 0 : index
    %39 = vector.load %arg5[%c5, %c0_39, %c0_40] : memref<9x128x128xbf16, #tpu.memory_space<vmem>>, vector<1x128x128xbf16>
    %40 = vector.shape_cast %39 : vector<1x128x128xbf16> to vector<128x128xbf16>
    %cst_41 = arith.constant dense<0.000000e+00> : vector<64x128xf32>
    %41 = tpu.matmul %38, %40, %cst_41 {dimension_numbers = #tpu.dot_dimension_numbers<[1], [0], [0], [1], [0, 0, 1, 1], [], []>} : vector<64x128xbf16>, vector<128x128xbf16>, vector<64x128xf32> -> vector<64x128xf32>
    %42 = arith.addf %35, %41 : vector<64x128xf32>
    %c0_42 = arith.constant 0 : index
    %c1_43 = arith.constant 1 : index
    %c0_44 = arith.constant 0 : index
    %c0_45 = arith.constant 0 : index
    %43 = vector.load %arg1[%c0_42, %c1_43, %c0_44, %c0_45] : memref<1x9x9x128xbf16, #tpu.memory_space<vmem>>, vector<1x8x8x128xbf16>
    %44 = vector.shape_cast %43 : vector<1x8x8x128xbf16> to vector<8x8x128xbf16>
    %45 = vector.shape_cast %44 : vector<8x8x128xbf16> to vector<64x128xbf16>
    %c6 = arith.constant 6 : index
    %c0_46 = arith.constant 0 : index
    %c0_47 = arith.constant 0 : index
    %46 = vector.load %arg5[%c6, %c0_46, %c0_47] : memref<9x128x128xbf16, #tpu.memory_space<vmem>>, vector<1x128x128xbf16>
    %47 = vector.shape_cast %46 : vector<1x128x128xbf16> to vector<128x128xbf16>
    %cst_48 = arith.constant dense<0.000000e+00> : vector<64x128xf32>
    %48 = tpu.matmul %45, %47, %cst_48 {dimension_numbers = #tpu.dot_dimension_numbers<[1], [0], [0], [1], [0, 0, 1, 1], [], []>} : vector<64x128xbf16>, vector<128x128xbf16>, vector<64x128xf32> -> vector<64x128xf32>
    %49 = arith.addf %42, %48 : vector<64x128xf32>
    %c0_49 = arith.constant 0 : index
    %c1_50 = arith.constant 1 : index
    %c0_51 = arith.constant 0 : index
    %c0_52 = arith.constant 0 : index
    %50 = vector.load %arg2[%c0_49, %c1_50, %c0_51, %c0_52] : memref<1x9x9x128xbf16, #tpu.memory_space<vmem>>, vector<1x8x8x128xbf16>
    %51 = vector.shape_cast %50 : vector<1x8x8x128xbf16> to vector<8x8x128xbf16>
    %52 = vector.shape_cast %51 : vector<8x8x128xbf16> to vector<64x128xbf16>
    %c7 = arith.constant 7 : index
    %c0_53 = arith.constant 0 : index
    %c0_54 = arith.constant 0 : index
    %53 = vector.load %arg5[%c7, %c0_53, %c0_54] : memref<9x128x128xbf16, #tpu.memory_space<vmem>>, vector<1x128x128xbf16>
    %54 = vector.shape_cast %53 : vector<1x128x128xbf16> to vector<128x128xbf16>
    %cst_55 = arith.constant dense<0.000000e+00> : vector<64x128xf32>
    %55 = tpu.matmul %52, %54, %cst_55 {dimension_numbers = #tpu.dot_dimension_numbers<[1], [0], [0], [1], [0, 0, 1, 1], [], []>} : vector<64x128xbf16>, vector<128x128xbf16>, vector<64x128xf32> -> vector<64x128xf32>
    %56 = arith.addf %49, %55 : vector<64x128xf32>
    %c0_56 = arith.constant 0 : index
    %c1_57 = arith.constant 1 : index
    %c1_58 = arith.constant 1 : index
    %c0_59 = arith.constant 0 : index
    %57 = vector.load %arg1[%c0_56, %c1_57, %c1_58, %c0_59] : memref<1x9x9x128xbf16, #tpu.memory_space<vmem>>, vector<1x8x8x128xbf16>
    %58 = vector.shape_cast %57 : vector<1x8x8x128xbf16> to vector<8x8x128xbf16>
    %59 = vector.shape_cast %58 : vector<8x8x128xbf16> to vector<64x128xbf16>
    %c8 = arith.constant 8 : index
    %c0_60 = arith.constant 0 : index
    %c0_61 = arith.constant 0 : index
    %60 = vector.load %arg5[%c8, %c0_60, %c0_61] : memref<9x128x128xbf16, #tpu.memory_space<vmem>>, vector<1x128x128xbf16>
    %61 = vector.shape_cast %60 : vector<1x128x128xbf16> to vector<128x128xbf16>
    %cst_62 = arith.constant dense<0.000000e+00> : vector<64x128xf32>
    %62 = tpu.matmul %59, %61, %cst_62 {dimension_numbers = #tpu.dot_dimension_numbers<[1], [0], [0], [1], [0, 0, 1, 1], [], []>} : vector<64x128xbf16>, vector<128x128xbf16>, vector<64x128xf32> -> vector<64x128xf32>
    %63 = arith.addf %56, %62 : vector<64x128xf32>
    %c0_63 = arith.constant 0 : index
    %c0_64 = arith.constant 0 : index
    %c0_65 = arith.constant 0 : index
    %64 = vector.load %arg6[%c0_63, %c0_64, %c0_65] : memref<1x64x128xf32, #tpu.memory_space<vmem>>, vector<1x64x128xf32>
    %65 = vector.shape_cast %64 : vector<1x64x128xf32> to vector<64x128xf32>
    %66 = vector.shape_cast %63 : vector<64x128xf32> to vector<1x64x128xf32>
    tpu.vector_store %arg6[%c0_63, %c0_64, %c0_65], %66 {strides = array<i32>} : memref<1x64x128xf32, #tpu.memory_space<vmem>>, vector<1x64x128xf32>,
    %cst_66 = arith.constant dense<0.000000e+00> : vector<128xf32>
    %67 = vector.multi_reduction <add>, %63, %cst_66 [0] : vector<64x128xf32> to vector<128xf32>
    %68 = vector.shape_cast %67 : vector<128xf32> to vector<1x128xf32>
    %c0_67 = arith.constant 0 : index
    %c0_68 = arith.constant 0 : index
    %c0_69 = arith.constant 0 : index
    %69 = vector.load %arg7[%c0_67, %c0_68, %c0_69] : memref<1x1x128xf32, #tpu.memory_space<vmem>>, vector<1x1x128xf32>
    %70 = vector.shape_cast %69 : vector<1x1x128xf32> to vector<1x128xf32>
    %71 = vector.shape_cast %68 : vector<1x128xf32> to vector<1x1x128xf32>
    tpu.vector_store %arg7[%c0_67, %c0_68, %c0_69], %71 {strides = array<i32>} : memref<1x1x128xf32, #tpu.memory_space<vmem>>, vector<1x1x128xf32>,
    %72 = arith.mulf %63, %63 : vector<64x128xf32>
    %cst_70 = arith.constant dense<0.000000e+00> : vector<128xf32>
    %73 = vector.multi_reduction <add>, %72, %cst_70 [0] : vector<64x128xf32> to vector<128xf32>
    %74 = vector.shape_cast %73 : vector<128xf32> to vector<1x128xf32>
    %c0_71 = arith.constant 0 : index
    %c0_72 = arith.constant 0 : index
    %c0_73 = arith.constant 0 : index
    %75 = vector.load %arg8[%c0_71, %c0_72, %c0_73] : memref<1x1x128xf32, #tpu.memory_space<vmem>>, vector<1x1x128xf32>
    %76 = vector.shape_cast %75 : vector<1x1x128xf32> to vector<1x128xf32>
    %77 = vector.shape_cast %74 : vector<1x128xf32> to vector<1x1x128xf32>
    tpu.vector_store %arg8[%c0_71, %c0_72, %c0_73], %77 {strides = array<i32>} : memref<1x1x128xf32, #tpu.memory_space<vmem>>, vector<1x1x128xf32>,
    return
  }
  func.func @transform_0(%arg0: i32) -> (i32, i32, i32, i32) {
    %c0_i32 = arith.constant 0 : i32
    %c0_i32_0 = arith.constant 0 : i32
    %c0_i32_1 = arith.constant 0 : i32
    %c0_i32_2 = arith.constant 0 : i32
    return %arg0, %c0_i32, %c0_i32_0, %c0_i32_1 : i32, i32, i32, i32
  }
  func.func @transform_1(%arg0: i32) -> (i32, i32, i32, i32) {
    %c0_i32 = arith.constant 0 : i32
    %c0_i32_0 = arith.constant 0 : i32
    %c0_i32_1 = arith.constant 0 : i32
    %c0_i32_2 = arith.constant 0 : i32
    return %arg0, %c0_i32, %c0_i32_0, %c0_i32_1 : i32, i32, i32, i32
  }
  func.func @transform_2(%arg0: i32) -> (i32, i32, i32, i32) {
    %c0_i32 = arith.constant 0 : i32
    %c0_i32_0 = arith.constant 0 : i32
    %c0_i32_1 = arith.constant 0 : i32
    %c0_i32_2 = arith.constant 0 : i32
    return %arg0, %c0_i32, %c0_i32_0, %c0_i32_1 : i32, i32, i32, i32
  }
  func.func @transform_3(%arg0: i32) -> (i32, i32, i32, i32) {
    %c0_i32 = arith.constant 0 : i32
    %c0_i32_0 = arith.constant 0 : i32
    %c0_i32_1 = arith.constant 0 : i32
    %c0_i32_2 = arith.constant 0 : i32
    return %arg0, %c0_i32, %c0_i32_0, %c0_i32_1 : i32, i32, i32, i32
  }
  func.func @transform_4(%arg0: i32) -> (i32, i32, i32) {
    %c0_i32 = arith.constant 0 : i32
    %c0_i32_0 = arith.constant 0 : i32
    %c0_i32_1 = arith.constant 0 : i32
    %c0_i32_2 = arith.constant 0 : i32
    return %c0_i32, %c0_i32_0, %c0_i32_1 : i32, i32, i32
  }
  func.func @transform_5(%arg0: i32) -> (i32, i32, i32) {
    %c0_i32 = arith.constant 0 : i32
    %c0_i32_0 = arith.constant 0 : i32
    %c0_i32_1 = arith.constant 0 : i32
    return %arg0, %c0_i32, %c0_i32_0 : i32, i32, i32
  }
  func.func @transform_6(%arg0: i32) -> (i32, i32, i32) {
    %c0_i32 = arith.constant 0 : i32
    %c0_i32_0 = arith.constant 0 : i32
    %c0_i32_1 = arith.constant 0 : i32
    return %arg0, %c0_i32, %c0_i32_0 : i32, i32, i32
  }
  func.func @transform_7(%arg0: i32) -> (i32, i32, i32) {
    %c0_i32 = arith.constant 0 : i32
    %c0_i32_0 = arith.constant 0 : i32
    %c0_i32_1 = arith.constant 0 : i32
    return %arg0, %c0_i32, %c0_i32_0 : i32, i32, i32
  }
}

module attributes {stable_mosaic.version = 11 : i64} {
  func.func @kernel(%arg0: i32, %arg1: memref<1x64x128xf32, #tpu.memory_space<vmem>>, %arg2: memref<1x128xf32, #tpu.memory_space<vmem>>, %arg3: memref<1x128xf32, #tpu.memory_space<vmem>>, %arg4: memref<9x128x128xbf16, #tpu.memory_space<vmem>>, %arg5: memref<1x64x128xbf16, #tpu.memory_space<vmem>>, %arg6: memref<128x128xbf16, #tpu.memory_space<vmem>>, %arg7: memref<1x64x128xf32, #tpu.memory_space<vmem>>, %arg8: memref<1x1x128xf32, #tpu.memory_space<vmem>>, %arg9: memref<1x1x128xf32, #tpu.memory_space<vmem>>, %arg10: memref<1x64x128xf32, #tpu.memory_space<vmem>>, %arg11: memref<1x1x128xf32, #tpu.memory_space<vmem>>, %arg12: memref<1x1x128xf32, #tpu.memory_space<vmem>>, %arg13: memref<10x10x128xf32, #tpu.memory_space<vmem>>) attributes {dimension_semantics = [#tpu.dimension_semantics<parallel>], iteration_bounds = array<i64: 2>, scalar_prefetch = 0 : i64, scratch_operands = 1 : i64, tpu.core_type = #tpu.core_type<tc>, window_params = [{transform_indices = @transform_0, window_bounds = array<i64: 1, 64, 128>}, {pipeline_mode = #tpu.pipeline_mode<synchronous>, transform_indices = @transform_1, window_bounds = array<i64: 1, 128>}, {pipeline_mode = #tpu.pipeline_mode<synchronous>, transform_indices = @transform_2, window_bounds = array<i64: 1, 128>}, {pipeline_mode = #tpu.pipeline_mode<synchronous>, transform_indices = @transform_3, window_bounds = array<i64: 9, 128, 128>}, {transform_indices = @transform_4, window_bounds = array<i64: 1, 64, 128>}, {pipeline_mode = #tpu.pipeline_mode<synchronous>, transform_indices = @transform_5, window_bounds = array<i64: 128, 128>}, {transform_indices = @transform_6, window_bounds = array<i64: 1, 64, 128>}, {transform_indices = @transform_7, window_bounds = array<i64: 1, 1, 128>}, {transform_indices = @transform_8, window_bounds = array<i64: 1, 1, 128>}, {transform_indices = @transform_9, window_bounds = array<i64: 1, 64, 128>}, {transform_indices = @transform_10, window_bounds = array<i64: 1, 1, 128>}, {transform_indices = @transform_11, window_bounds = array<i64: 1, 1, 128>}]} {
    %c0 = arith.constant 0 : index
    %c0_0 = arith.constant 0 : index
    %c0_1 = arith.constant 0 : index
    %0 = vector.load %arg1[%c0, %c0_0, %c0_1] : memref<1x64x128xf32, #tpu.memory_space<vmem>>, vector<1x64x128xf32>
    %1 = vector.shape_cast %0 : vector<1x64x128xf32> to vector<64x128xf32>
    %c0_2 = arith.constant 0 : index
    %c0_3 = arith.constant 0 : index
    %2 = vector.load %arg2[%c0_2, %c0_3] : memref<1x128xf32, #tpu.memory_space<vmem>>, vector<1x128xf32>
    %3 = vector.broadcast %2 : vector<1x128xf32> to vector<64x128xf32>
    %4 = arith.mulf %1, %3 : vector<64x128xf32>
    %c0_4 = arith.constant 0 : index
    %c0_5 = arith.constant 0 : index
    %5 = vector.load %arg3[%c0_4, %c0_5] : memref<1x128xf32, #tpu.memory_space<vmem>>, vector<1x128xf32>
    %6 = vector.broadcast %5 : vector<1x128xf32> to vector<64x128xf32>
    %7 = arith.addf %4, %6 : vector<64x128xf32>
    %cst = arith.constant 0.000000e+00 : f32
    %8 = vector.broadcast %cst : f32 to vector<10x10x128xf32>
    %c0_6 = arith.constant 0 : index
    %c0_7 = arith.constant 0 : index
    %c0_8 = arith.constant 0 : index
    %9 = vector.load %arg13[%c0_6, %c0_7, %c0_8] : memref<10x10x128xf32, #tpu.memory_space<vmem>>, vector<10x10x128xf32>
    tpu.vector_store %arg13[%c0_6, %c0_7, %c0_8], %8 {strides = array<i32>} : memref<10x10x128xf32, #tpu.memory_space<vmem>>, vector<10x10x128xf32>,
    %10 = vector.shape_cast %7 : vector<64x128xf32> to vector<8x8x128xf32>
    %c1 = arith.constant 1 : index
    %c1_9 = arith.constant 1 : index
    %c0_10 = arith.constant 0 : index
    %11 = vector.load %arg13[%c1, %c1_9, %c0_10] : memref<10x10x128xf32, #tpu.memory_space<vmem>>, vector<8x8x128xf32>
    tpu.vector_store %arg13[%c1, %c1_9, %c0_10], %10 {strides = array<i32>} : memref<10x10x128xf32, #tpu.memory_space<vmem>>, vector<8x8x128xf32>,
    %cst_11 = arith.constant 0.000000e+00 : f32
    %12 = vector.broadcast %cst_11 : f32 to vector<64x128xf32>
    %c0_12 = arith.constant 0 : index
    %c0_13 = arith.constant 0 : index
    %c0_14 = arith.constant 0 : index
    %13 = vector.load %arg13[%c0_12, %c0_13, %c0_14] : memref<10x10x128xf32, #tpu.memory_space<vmem>>, vector<8x8x128xf32>
    %14 = vector.shape_cast %13 : vector<8x8x128xf32> to vector<64x128xf32>
    %15 = arith.truncf %14 : vector<64x128xf32> to vector<64x128xbf16>
    %c0_15 = arith.constant 0 : index
    %c0_16 = arith.constant 0 : index
    %c0_17 = arith.constant 0 : index
    %16 = vector.load %arg4[%c0_15, %c0_16, %c0_17] : memref<9x128x128xbf16, #tpu.memory_space<vmem>>, vector<1x128x128xbf16>
    %17 = vector.shape_cast %16 : vector<1x128x128xbf16> to vector<128x128xbf16>
    %cst_18 = arith.constant dense<0.000000e+00> : vector<64x128xf32>
    %18 = tpu.matmul %15, %17, %cst_18 {dimension_numbers = #tpu.dot_dimension_numbers<[1], [0], [0], [1], [0, 0, 1, 1], [], []>} : vector<64x128xbf16>, vector<128x128xbf16>, vector<64x128xf32> -> vector<64x128xf32>
    %19 = arith.addf %12, %18 : vector<64x128xf32>
    %c0_19 = arith.constant 0 : index
    %c1_20 = arith.constant 1 : index
    %c0_21 = arith.constant 0 : index
    %20 = vector.load %arg13[%c0_19, %c1_20, %c0_21] : memref<10x10x128xf32, #tpu.memory_space<vmem>>, vector<8x8x128xf32>
    %21 = vector.shape_cast %20 : vector<8x8x128xf32> to vector<64x128xf32>
    %22 = arith.truncf %21 : vector<64x128xf32> to vector<64x128xbf16>
    %c1_22 = arith.constant 1 : index
    %c0_23 = arith.constant 0 : index
    %c0_24 = arith.constant 0 : index
    %23 = vector.load %arg4[%c1_22, %c0_23, %c0_24] : memref<9x128x128xbf16, #tpu.memory_space<vmem>>, vector<1x128x128xbf16>
    %24 = vector.shape_cast %23 : vector<1x128x128xbf16> to vector<128x128xbf16>
    %cst_25 = arith.constant dense<0.000000e+00> : vector<64x128xf32>
    %25 = tpu.matmul %22, %24, %cst_25 {dimension_numbers = #tpu.dot_dimension_numbers<[1], [0], [0], [1], [0, 0, 1, 1], [], []>} : vector<64x128xbf16>, vector<128x128xbf16>, vector<64x128xf32> -> vector<64x128xf32>
    %26 = arith.addf %19, %25 : vector<64x128xf32>
    %c0_26 = arith.constant 0 : index
    %c2 = arith.constant 2 : index
    %c0_27 = arith.constant 0 : index
    %27 = vector.load %arg13[%c0_26, %c2, %c0_27] : memref<10x10x128xf32, #tpu.memory_space<vmem>>, vector<8x8x128xf32>
    %28 = vector.shape_cast %27 : vector<8x8x128xf32> to vector<64x128xf32>
    %29 = arith.truncf %28 : vector<64x128xf32> to vector<64x128xbf16>
    %c2_28 = arith.constant 2 : index
    %c0_29 = arith.constant 0 : index
    %c0_30 = arith.constant 0 : index
    %30 = vector.load %arg4[%c2_28, %c0_29, %c0_30] : memref<9x128x128xbf16, #tpu.memory_space<vmem>>, vector<1x128x128xbf16>
    %31 = vector.shape_cast %30 : vector<1x128x128xbf16> to vector<128x128xbf16>
    %cst_31 = arith.constant dense<0.000000e+00> : vector<64x128xf32>
    %32 = tpu.matmul %29, %31, %cst_31 {dimension_numbers = #tpu.dot_dimension_numbers<[1], [0], [0], [1], [0, 0, 1, 1], [], []>} : vector<64x128xbf16>, vector<128x128xbf16>, vector<64x128xf32> -> vector<64x128xf32>
    %33 = arith.addf %26, %32 : vector<64x128xf32>
    %c1_32 = arith.constant 1 : index
    %c0_33 = arith.constant 0 : index
    %c0_34 = arith.constant 0 : index
    %34 = vector.load %arg13[%c1_32, %c0_33, %c0_34] : memref<10x10x128xf32, #tpu.memory_space<vmem>>, vector<8x8x128xf32>
    %35 = vector.shape_cast %34 : vector<8x8x128xf32> to vector<64x128xf32>
    %36 = arith.truncf %35 : vector<64x128xf32> to vector<64x128xbf16>
    %c3 = arith.constant 3 : index
    %c0_35 = arith.constant 0 : index
    %c0_36 = arith.constant 0 : index
    %37 = vector.load %arg4[%c3, %c0_35, %c0_36] : memref<9x128x128xbf16, #tpu.memory_space<vmem>>, vector<1x128x128xbf16>
    %38 = vector.shape_cast %37 : vector<1x128x128xbf16> to vector<128x128xbf16>
    %cst_37 = arith.constant dense<0.000000e+00> : vector<64x128xf32>
    %39 = tpu.matmul %36, %38, %cst_37 {dimension_numbers = #tpu.dot_dimension_numbers<[1], [0], [0], [1], [0, 0, 1, 1], [], []>} : vector<64x128xbf16>, vector<128x128xbf16>, vector<64x128xf32> -> vector<64x128xf32>
    %40 = arith.addf %33, %39 : vector<64x128xf32>
    %c1_38 = arith.constant 1 : index
    %c1_39 = arith.constant 1 : index
    %c0_40 = arith.constant 0 : index
    %41 = vector.load %arg13[%c1_38, %c1_39, %c0_40] : memref<10x10x128xf32, #tpu.memory_space<vmem>>, vector<8x8x128xf32>
    %42 = vector.shape_cast %41 : vector<8x8x128xf32> to vector<64x128xf32>
    %43 = arith.truncf %42 : vector<64x128xf32> to vector<64x128xbf16>
    %c4 = arith.constant 4 : index
    %c0_41 = arith.constant 0 : index
    %c0_42 = arith.constant 0 : index
    %44 = vector.load %arg4[%c4, %c0_41, %c0_42] : memref<9x128x128xbf16, #tpu.memory_space<vmem>>, vector<1x128x128xbf16>
    %45 = vector.shape_cast %44 : vector<1x128x128xbf16> to vector<128x128xbf16>
    %cst_43 = arith.constant dense<0.000000e+00> : vector<64x128xf32>
    %46 = tpu.matmul %43, %45, %cst_43 {dimension_numbers = #tpu.dot_dimension_numbers<[1], [0], [0], [1], [0, 0, 1, 1], [], []>} : vector<64x128xbf16>, vector<128x128xbf16>, vector<64x128xf32> -> vector<64x128xf32>
    %47 = arith.addf %40, %46 : vector<64x128xf32>
    %c1_44 = arith.constant 1 : index
    %c2_45 = arith.constant 2 : index
    %c0_46 = arith.constant 0 : index
    %48 = vector.load %arg13[%c1_44, %c2_45, %c0_46] : memref<10x10x128xf32, #tpu.memory_space<vmem>>, vector<8x8x128xf32>
    %49 = vector.shape_cast %48 : vector<8x8x128xf32> to vector<64x128xf32>
    %50 = arith.truncf %49 : vector<64x128xf32> to vector<64x128xbf16>
    %c5 = arith.constant 5 : index
    %c0_47 = arith.constant 0 : index
    %c0_48 = arith.constant 0 : index
    %51 = vector.load %arg4[%c5, %c0_47, %c0_48] : memref<9x128x128xbf16, #tpu.memory_space<vmem>>, vector<1x128x128xbf16>
    %52 = vector.shape_cast %51 : vector<1x128x128xbf16> to vector<128x128xbf16>
    %cst_49 = arith.constant dense<0.000000e+00> : vector<64x128xf32>
    %53 = tpu.matmul %50, %52, %cst_49 {dimension_numbers = #tpu.dot_dimension_numbers<[1], [0], [0], [1], [0, 0, 1, 1], [], []>} : vector<64x128xbf16>, vector<128x128xbf16>, vector<64x128xf32> -> vector<64x128xf32>
    %54 = arith.addf %47, %53 : vector<64x128xf32>
    %c2_50 = arith.constant 2 : index
    %c0_51 = arith.constant 0 : index
    %c0_52 = arith.constant 0 : index
    %55 = vector.load %arg13[%c2_50, %c0_51, %c0_52] : memref<10x10x128xf32, #tpu.memory_space<vmem>>, vector<8x8x128xf32>
    %56 = vector.shape_cast %55 : vector<8x8x128xf32> to vector<64x128xf32>
    %57 = arith.truncf %56 : vector<64x128xf32> to vector<64x128xbf16>
    %c6 = arith.constant 6 : index
    %c0_53 = arith.constant 0 : index
    %c0_54 = arith.constant 0 : index
    %58 = vector.load %arg4[%c6, %c0_53, %c0_54] : memref<9x128x128xbf16, #tpu.memory_space<vmem>>, vector<1x128x128xbf16>
    %59 = vector.shape_cast %58 : vector<1x128x128xbf16> to vector<128x128xbf16>
    %cst_55 = arith.constant dense<0.000000e+00> : vector<64x128xf32>
    %60 = tpu.matmul %57, %59, %cst_55 {dimension_numbers = #tpu.dot_dimension_numbers<[1], [0], [0], [1], [0, 0, 1, 1], [], []>} : vector<64x128xbf16>, vector<128x128xbf16>, vector<64x128xf32> -> vector<64x128xf32>
    %61 = arith.addf %54, %60 : vector<64x128xf32>
    %c2_56 = arith.constant 2 : index
    %c1_57 = arith.constant 1 : index
    %c0_58 = arith.constant 0 : index
    %62 = vector.load %arg13[%c2_56, %c1_57, %c0_58] : memref<10x10x128xf32, #tpu.memory_space<vmem>>, vector<8x8x128xf32>
    %63 = vector.shape_cast %62 : vector<8x8x128xf32> to vector<64x128xf32>
    %64 = arith.truncf %63 : vector<64x128xf32> to vector<64x128xbf16>
    %c7 = arith.constant 7 : index
    %c0_59 = arith.constant 0 : index
    %c0_60 = arith.constant 0 : index
    %65 = vector.load %arg4[%c7, %c0_59, %c0_60] : memref<9x128x128xbf16, #tpu.memory_space<vmem>>, vector<1x128x128xbf16>
    %66 = vector.shape_cast %65 : vector<1x128x128xbf16> to vector<128x128xbf16>
    %cst_61 = arith.constant dense<0.000000e+00> : vector<64x128xf32>
    %67 = tpu.matmul %64, %66, %cst_61 {dimension_numbers = #tpu.dot_dimension_numbers<[1], [0], [0], [1], [0, 0, 1, 1], [], []>} : vector<64x128xbf16>, vector<128x128xbf16>, vector<64x128xf32> -> vector<64x128xf32>
    %68 = arith.addf %61, %67 : vector<64x128xf32>
    %c2_62 = arith.constant 2 : index
    %c2_63 = arith.constant 2 : index
    %c0_64 = arith.constant 0 : index
    %69 = vector.load %arg13[%c2_62, %c2_63, %c0_64] : memref<10x10x128xf32, #tpu.memory_space<vmem>>, vector<8x8x128xf32>
    %70 = vector.shape_cast %69 : vector<8x8x128xf32> to vector<64x128xf32>
    %71 = arith.truncf %70 : vector<64x128xf32> to vector<64x128xbf16>
    %c8 = arith.constant 8 : index
    %c0_65 = arith.constant 0 : index
    %c0_66 = arith.constant 0 : index
    %72 = vector.load %arg4[%c8, %c0_65, %c0_66] : memref<9x128x128xbf16, #tpu.memory_space<vmem>>, vector<1x128x128xbf16>
    %73 = vector.shape_cast %72 : vector<1x128x128xbf16> to vector<128x128xbf16>
    %cst_67 = arith.constant dense<0.000000e+00> : vector<64x128xf32>
    %74 = tpu.matmul %71, %73, %cst_67 {dimension_numbers = #tpu.dot_dimension_numbers<[1], [0], [0], [1], [0, 0, 1, 1], [], []>} : vector<64x128xbf16>, vector<128x128xbf16>, vector<64x128xf32> -> vector<64x128xf32>
    %75 = arith.addf %68, %74 : vector<64x128xf32>
    %c0_68 = arith.constant 0 : index
    %c0_69 = arith.constant 0 : index
    %c0_70 = arith.constant 0 : index
    %76 = vector.load %arg7[%c0_68, %c0_69, %c0_70] : memref<1x64x128xf32, #tpu.memory_space<vmem>>, vector<1x64x128xf32>
    %77 = vector.shape_cast %76 : vector<1x64x128xf32> to vector<64x128xf32>
    %78 = vector.shape_cast %75 : vector<64x128xf32> to vector<1x64x128xf32>
    tpu.vector_store %arg7[%c0_68, %c0_69, %c0_70], %78 {strides = array<i32>} : memref<1x64x128xf32, #tpu.memory_space<vmem>>, vector<1x64x128xf32>,
    %cst_71 = arith.constant dense<0.000000e+00> : vector<128xf32>
    %79 = vector.multi_reduction <add>, %75, %cst_71 [0] : vector<64x128xf32> to vector<128xf32>
    %80 = vector.shape_cast %79 : vector<128xf32> to vector<1x128xf32>
    %c0_72 = arith.constant 0 : index
    %c0_73 = arith.constant 0 : index
    %c0_74 = arith.constant 0 : index
    %81 = vector.load %arg8[%c0_72, %c0_73, %c0_74] : memref<1x1x128xf32, #tpu.memory_space<vmem>>, vector<1x1x128xf32>
    %82 = vector.shape_cast %81 : vector<1x1x128xf32> to vector<1x128xf32>
    %83 = vector.shape_cast %80 : vector<1x128xf32> to vector<1x1x128xf32>
    tpu.vector_store %arg8[%c0_72, %c0_73, %c0_74], %83 {strides = array<i32>} : memref<1x1x128xf32, #tpu.memory_space<vmem>>, vector<1x1x128xf32>,
    %84 = arith.mulf %75, %75 : vector<64x128xf32>
    %cst_75 = arith.constant dense<0.000000e+00> : vector<128xf32>
    %85 = vector.multi_reduction <add>, %84, %cst_75 [0] : vector<64x128xf32> to vector<128xf32>
    %86 = vector.shape_cast %85 : vector<128xf32> to vector<1x128xf32>
    %c0_76 = arith.constant 0 : index
    %c0_77 = arith.constant 0 : index
    %c0_78 = arith.constant 0 : index
    %87 = vector.load %arg9[%c0_76, %c0_77, %c0_78] : memref<1x1x128xf32, #tpu.memory_space<vmem>>, vector<1x1x128xf32>
    %88 = vector.shape_cast %87 : vector<1x1x128xf32> to vector<1x128xf32>
    %89 = vector.shape_cast %86 : vector<1x128xf32> to vector<1x1x128xf32>
    tpu.vector_store %arg9[%c0_76, %c0_77, %c0_78], %89 {strides = array<i32>} : memref<1x1x128xf32, #tpu.memory_space<vmem>>, vector<1x1x128xf32>,
    %c0_79 = arith.constant 0 : index
    %c0_80 = arith.constant 0 : index
    %c0_81 = arith.constant 0 : index
    %90 = vector.load %arg5[%c0_79, %c0_80, %c0_81] : memref<1x64x128xbf16, #tpu.memory_space<vmem>>, vector<1x64x128xbf16>
    %91 = vector.shape_cast %90 : vector<1x64x128xbf16> to vector<64x128xbf16>
    %c0_82 = arith.constant 0 : index
    %c0_83 = arith.constant 0 : index
    %92 = vector.load %arg6[%c0_82, %c0_83] : memref<128x128xbf16, #tpu.memory_space<vmem>>, vector<128x128xbf16>
    %cst_84 = arith.constant dense<0.000000e+00> : vector<64x128xf32>
    %93 = tpu.matmul %91, %92, %cst_84 {dimension_numbers = #tpu.dot_dimension_numbers<[1], [0], [0], [1], [0, 0, 1, 1], [], []>} : vector<64x128xbf16>, vector<128x128xbf16>, vector<64x128xf32> -> vector<64x128xf32>
    %c0_85 = arith.constant 0 : index
    %c0_86 = arith.constant 0 : index
    %c0_87 = arith.constant 0 : index
    %94 = vector.load %arg10[%c0_85, %c0_86, %c0_87] : memref<1x64x128xf32, #tpu.memory_space<vmem>>, vector<1x64x128xf32>
    %95 = vector.shape_cast %94 : vector<1x64x128xf32> to vector<64x128xf32>
    %96 = vector.shape_cast %93 : vector<64x128xf32> to vector<1x64x128xf32>
    tpu.vector_store %arg10[%c0_85, %c0_86, %c0_87], %96 {strides = array<i32>} : memref<1x64x128xf32, #tpu.memory_space<vmem>>, vector<1x64x128xf32>,
    %cst_88 = arith.constant dense<0.000000e+00> : vector<128xf32>
    %97 = vector.multi_reduction <add>, %93, %cst_88 [0] : vector<64x128xf32> to vector<128xf32>
    %98 = vector.shape_cast %97 : vector<128xf32> to vector<1x128xf32>
    %c0_89 = arith.constant 0 : index
    %c0_90 = arith.constant 0 : index
    %c0_91 = arith.constant 0 : index
    %99 = vector.load %arg11[%c0_89, %c0_90, %c0_91] : memref<1x1x128xf32, #tpu.memory_space<vmem>>, vector<1x1x128xf32>
    %100 = vector.shape_cast %99 : vector<1x1x128xf32> to vector<1x128xf32>
    %101 = vector.shape_cast %98 : vector<1x128xf32> to vector<1x1x128xf32>
    tpu.vector_store %arg11[%c0_89, %c0_90, %c0_91], %101 {strides = array<i32>} : memref<1x1x128xf32, #tpu.memory_space<vmem>>, vector<1x1x128xf32>,
    %102 = arith.mulf %93, %93 : vector<64x128xf32>
    %cst_92 = arith.constant dense<0.000000e+00> : vector<128xf32>
    %103 = vector.multi_reduction <add>, %102, %cst_92 [0] : vector<64x128xf32> to vector<128xf32>
    %104 = vector.shape_cast %103 : vector<128xf32> to vector<1x128xf32>
    %c0_93 = arith.constant 0 : index
    %c0_94 = arith.constant 0 : index
    %c0_95 = arith.constant 0 : index
    %105 = vector.load %arg12[%c0_93, %c0_94, %c0_95] : memref<1x1x128xf32, #tpu.memory_space<vmem>>, vector<1x1x128xf32>
    %106 = vector.shape_cast %105 : vector<1x1x128xf32> to vector<1x128xf32>
    %107 = vector.shape_cast %104 : vector<1x128xf32> to vector<1x1x128xf32>
    tpu.vector_store %arg12[%c0_93, %c0_94, %c0_95], %107 {strides = array<i32>} : memref<1x1x128xf32, #tpu.memory_space<vmem>>, vector<1x1x128xf32>,
    return
  }
  func.func @transform_0(%arg0: i32) -> (i32, i32, i32) {
    %c0_i32 = arith.constant 0 : i32
    %c0_i32_0 = arith.constant 0 : i32
    %c0_i32_1 = arith.constant 0 : i32
    return %arg0, %c0_i32, %c0_i32_0 : i32, i32, i32
  }
  func.func @transform_1(%arg0: i32) -> (i32, i32) {
    %c0_i32 = arith.constant 0 : i32
    %c0_i32_0 = arith.constant 0 : i32
    %c0_i32_1 = arith.constant 0 : i32
    return %c0_i32, %c0_i32_0 : i32, i32
  }
  func.func @transform_2(%arg0: i32) -> (i32, i32) {
    %c0_i32 = arith.constant 0 : i32
    %c0_i32_0 = arith.constant 0 : i32
    %c0_i32_1 = arith.constant 0 : i32
    return %c0_i32, %c0_i32_0 : i32, i32
  }
  func.func @transform_3(%arg0: i32) -> (i32, i32, i32) {
    %c0_i32 = arith.constant 0 : i32
    %c0_i32_0 = arith.constant 0 : i32
    %c0_i32_1 = arith.constant 0 : i32
    %c0_i32_2 = arith.constant 0 : i32
    return %c0_i32, %c0_i32_0, %c0_i32_1 : i32, i32, i32
  }
  func.func @transform_4(%arg0: i32) -> (i32, i32, i32) {
    %c0_i32 = arith.constant 0 : i32
    %c0_i32_0 = arith.constant 0 : i32
    %c0_i32_1 = arith.constant 0 : i32
    return %arg0, %c0_i32, %c0_i32_0 : i32, i32, i32
  }
  func.func @transform_5(%arg0: i32) -> (i32, i32) {
    %c0_i32 = arith.constant 0 : i32
    %c0_i32_0 = arith.constant 0 : i32
    %c0_i32_1 = arith.constant 0 : i32
    return %c0_i32, %c0_i32_0 : i32, i32
  }
  func.func @transform_6(%arg0: i32) -> (i32, i32, i32) {
    %c0_i32 = arith.constant 0 : i32
    %c0_i32_0 = arith.constant 0 : i32
    %c0_i32_1 = arith.constant 0 : i32
    return %arg0, %c0_i32, %c0_i32_0 : i32, i32, i32
  }
  func.func @transform_7(%arg0: i32) -> (i32, i32, i32) {
    %c0_i32 = arith.constant 0 : i32
    %c0_i32_0 = arith.constant 0 : i32
    %c0_i32_1 = arith.constant 0 : i32
    return %arg0, %c0_i32, %c0_i32_0 : i32, i32, i32
  }
  func.func @transform_8(%arg0: i32) -> (i32, i32, i32) {
    %c0_i32 = arith.constant 0 : i32
    %c0_i32_0 = arith.constant 0 : i32
    %c0_i32_1 = arith.constant 0 : i32
    return %arg0, %c0_i32, %c0_i32_0 : i32, i32, i32
  }
  func.func @transform_9(%arg0: i32) -> (i32, i32, i32) {
    %c0_i32 = arith.constant 0 : i32
    %c0_i32_0 = arith.constant 0 : i32
    %c0_i32_1 = arith.constant 0 : i32
    return %arg0, %c0_i32, %c0_i32_0 : i32, i32, i32
  }
  func.func @transform_10(%arg0: i32) -> (i32, i32, i32) {
    %c0_i32 = arith.constant 0 : i32
    %c0_i32_0 = arith.constant 0 : i32
    %c0_i32_1 = arith.constant 0 : i32
    return %arg0, %c0_i32, %c0_i32_0 : i32, i32, i32
  }
  func.func @transform_11(%arg0: i32) -> (i32, i32, i32) {
    %c0_i32 = arith.constant 0 : i32
    %c0_i32_0 = arith.constant 0 : i32
    %c0_i32_1 = arith.constant 0 : i32
    return %arg0, %c0_i32, %c0_i32_0 : i32, i32, i32
  }
}

module attributes {stable_mosaic.version = 11 : i64} {
  func.func @kernel(%arg0: i32, %arg1: memref<1x64x128xf32, #tpu.memory_space<vmem>>, %arg2: memref<1x128xf32, #tpu.memory_space<vmem>>, %arg3: memref<1x128xf32, #tpu.memory_space<vmem>>, %arg4: memref<1x64x128xf32, #tpu.memory_space<vmem>>, %arg5: memref<1x128xf32, #tpu.memory_space<vmem>>, %arg6: memref<1x128xf32, #tpu.memory_space<vmem>>, %arg7: memref<1x64x128xf32, #tpu.memory_space<vmem>>) attributes {dimension_semantics = [#tpu.dimension_semantics<parallel>], iteration_bounds = array<i64: 2>, scalar_prefetch = 0 : i64, scratch_operands = 0 : i64, tpu.core_type = #tpu.core_type<tc>, window_params = [{transform_indices = @transform_0, window_bounds = array<i64: 1, 64, 128>}, {pipeline_mode = #tpu.pipeline_mode<synchronous>, transform_indices = @transform_1, window_bounds = array<i64: 1, 128>}, {pipeline_mode = #tpu.pipeline_mode<synchronous>, transform_indices = @transform_2, window_bounds = array<i64: 1, 128>}, {transform_indices = @transform_3, window_bounds = array<i64: 1, 64, 128>}, {pipeline_mode = #tpu.pipeline_mode<synchronous>, transform_indices = @transform_4, window_bounds = array<i64: 1, 128>}, {pipeline_mode = #tpu.pipeline_mode<synchronous>, transform_indices = @transform_5, window_bounds = array<i64: 1, 128>}, {transform_indices = @transform_6, window_bounds = array<i64: 1, 64, 128>}]} {
    %c0 = arith.constant 0 : index
    %c0_0 = arith.constant 0 : index
    %c0_1 = arith.constant 0 : index
    %0 = vector.load %arg1[%c0, %c0_0, %c0_1] : memref<1x64x128xf32, #tpu.memory_space<vmem>>, vector<1x64x128xf32>
    %1 = vector.shape_cast %0 : vector<1x64x128xf32> to vector<64x128xf32>
    %c0_2 = arith.constant 0 : index
    %c0_3 = arith.constant 0 : index
    %2 = vector.load %arg2[%c0_2, %c0_3] : memref<1x128xf32, #tpu.memory_space<vmem>>, vector<1x128xf32>
    %3 = vector.broadcast %2 : vector<1x128xf32> to vector<64x128xf32>
    %4 = arith.mulf %1, %3 : vector<64x128xf32>
    %c0_4 = arith.constant 0 : index
    %c0_5 = arith.constant 0 : index
    %5 = vector.load %arg3[%c0_4, %c0_5] : memref<1x128xf32, #tpu.memory_space<vmem>>, vector<1x128xf32>
    %6 = vector.broadcast %5 : vector<1x128xf32> to vector<64x128xf32>
    %7 = arith.addf %4, %6 : vector<64x128xf32>
    %c0_6 = arith.constant 0 : index
    %c0_7 = arith.constant 0 : index
    %c0_8 = arith.constant 0 : index
    %8 = vector.load %arg4[%c0_6, %c0_7, %c0_8] : memref<1x64x128xf32, #tpu.memory_space<vmem>>, vector<1x64x128xf32>
    %9 = vector.shape_cast %8 : vector<1x64x128xf32> to vector<64x128xf32>
    %c0_9 = arith.constant 0 : index
    %c0_10 = arith.constant 0 : index
    %10 = vector.load %arg5[%c0_9, %c0_10] : memref<1x128xf32, #tpu.memory_space<vmem>>, vector<1x128xf32>
    %11 = vector.broadcast %10 : vector<1x128xf32> to vector<64x128xf32>
    %12 = arith.mulf %9, %11 : vector<64x128xf32>
    %13 = arith.addf %7, %12 : vector<64x128xf32>
    %c0_11 = arith.constant 0 : index
    %c0_12 = arith.constant 0 : index
    %14 = vector.load %arg6[%c0_11, %c0_12] : memref<1x128xf32, #tpu.memory_space<vmem>>, vector<1x128xf32>
    %15 = vector.broadcast %14 : vector<1x128xf32> to vector<64x128xf32>
    %16 = arith.addf %13, %15 : vector<64x128xf32>
    %c0_13 = arith.constant 0 : index
    %c0_14 = arith.constant 0 : index
    %c0_15 = arith.constant 0 : index
    %17 = vector.load %arg7[%c0_13, %c0_14, %c0_15] : memref<1x64x128xf32, #tpu.memory_space<vmem>>, vector<1x64x128xf32>
    %18 = vector.shape_cast %17 : vector<1x64x128xf32> to vector<64x128xf32>
    %19 = vector.shape_cast %16 : vector<64x128xf32> to vector<1x64x128xf32>
    tpu.vector_store %arg7[%c0_13, %c0_14, %c0_15], %19 {strides = array<i32>} : memref<1x64x128xf32, #tpu.memory_space<vmem>>, vector<1x64x128xf32>,
    return
  }
  func.func @transform_0(%arg0: i32) -> (i32, i32, i32) {
    %c0_i32 = arith.constant 0 : i32
    %c0_i32_0 = arith.constant 0 : i32
    %c0_i32_1 = arith.constant 0 : i32
    return %arg0, %c0_i32, %c0_i32_0 : i32, i32, i32
  }
  func.func @transform_1(%arg0: i32) -> (i32, i32) {
    %c0_i32 = arith.constant 0 : i32
    %c0_i32_0 = arith.constant 0 : i32
    %c0_i32_1 = arith.constant 0 : i32
    return %c0_i32, %c0_i32_0 : i32, i32
  }
  func.func @transform_2(%arg0: i32) -> (i32, i32) {
    %c0_i32 = arith.constant 0 : i32
    %c0_i32_0 = arith.constant 0 : i32
    %c0_i32_1 = arith.constant 0 : i32
    return %c0_i32, %c0_i32_0 : i32, i32
  }
  func.func @transform_3(%arg0: i32) -> (i32, i32, i32) {
    %c0_i32 = arith.constant 0 : i32
    %c0_i32_0 = arith.constant 0 : i32
    %c0_i32_1 = arith.constant 0 : i32
    return %arg0, %c0_i32, %c0_i32_0 : i32, i32, i32
  }
  func.func @transform_4(%arg0: i32) -> (i32, i32) {
    %c0_i32 = arith.constant 0 : i32
    %c0_i32_0 = arith.constant 0 : i32
    %c0_i32_1 = arith.constant 0 : i32
    return %c0_i32, %c0_i32_0 : i32, i32
  }
  func.func @transform_5(%arg0: i32) -> (i32, i32) {
    %c0_i32 = arith.constant 0 : i32
    %c0_i32_0 = arith.constant 0 : i32
    %c0_i32_1 = arith.constant 0 : i32
    return %c0_i32, %c0_i32_0 : i32, i32
  }
  func.func @transform_6(%arg0: i32) -> (i32, i32, i32) {
    %c0_i32 = arith.constant 0 : i32
    %c0_i32_0 = arith.constant 0 : i32
    %c0_i32_1 = arith.constant 0 : i32
    return %arg0, %c0_i32, %c0_i32_0 : i32, i32, i32
  }
}

</mosaic_0001>

<bundles_post_ra>
// kernel: basic_block_forward.5
= control target key start
LH: loop header
LB: loop body
LE: loop exit
PB: predicated region body
PF: predicated region fallthrough
CT: control target
= control target key end

     0   :  { %s502_s21 = smov 0   ;;  %s569_s0 = inlined_call_operand.vmem [shape: f32[2,64,128], index: 0, kind: input, shape index: {}]   ;;  %s570_s1 = inlined_call_operand.vmem [shape: f32[1,128], index: 1, kind: input, shape index: {}]   ;;  %s571_s2 = inlined_call_operand.vmem [shape: f32[1,128], index: 2, kind: input, shape index: {}]   ;;  %s572_s3 = inlined_call_operand.vmem [shape: f32[2,64,128], index: 3, kind: input, shape index: {}]   ;;  %s573_s4 = inlined_call_operand.vmem [shape: f32[1,128], index: 4, kind: input, shape index: {}]   ;;  %s574_s5 = inlined_call_operand.vmem [shape: f32[1,128], index: 5, kind: input, shape index: {}]   ;;  %s575_s6 = inlined_call_operand.vmem [shape: f32[2,64,128], index: 6, kind: output, shape index: {}]  }
   0x1 LB: > { %s431_s22 = sadd.s32 4294967295, %s465_s21   ;;  %p435_p0 = scmp.ge.s32.totalorder %s465_s21, 1  ;;  %s465_s21 = sphi %s502_s21, %s16_s21  }
   0x2   : > { %p222_p1 = scmp.lt.s32.totalorder %s465_s21, 3 }
   0x4   : > { %p223_p2 = pnand %p435_p0, %p222_p1 }
   0x5   : > { %p257_p3 = scmp.lt.s32.totalorder (!%p223_p2), %s431_s22, 1  ;;  %v442_v0 = vld [vmem:[%s570_s1] ss:$0 sm:$0xff] (!%p223_p2) }
   0x6   : > { %226 = sbr.rel (%p223_p2) target bundleno = 34 (0x22), region = 44  ;;  %v444_v1 = vld [vmem:[%s573_s4] ss:$0 sm:$0xff] (!%p223_p2) }
   0x7   : > { %v443_v2 = vld [vmem:[%s571_s2] ss:$0 sm:$0xff] (!%p223_p2) }
   0x8   : > { %v445_v25 = vld [vmem:[%s574_s5] ss:$0 sm:$0xff] (!%p223_p2) }
   0xd   : > { %s577_s22 = smov (!%p257_p3, %s431_s22), 1 }
   0xe   : > { %s510_s23 = sshll.u32 %s577_s22, 6 }
   0xf   : > { %s522_s30 = scalar_lea.vmem %s569_s0, %s510_s23  ;;  %s528_s9 = scalar_lea.vmem %s572_s3, %s510_s23 }
  0x10   : > { %v272_v3 = vld [vmem:[%s522_s30] sm:$0xff]  ;;  %v273_v5 = vld [vmem:[%s522_s30 + $0x8] sm:$0xff]  ;;  %v274_v10 = vld [vmem:[%s522_s30 + $0x10] sm:$0xff]  ;;  %s554_s16 = scalar_lea.vmem %s575_s6, %s510_s23 }
  0x11   : > { %v310_v4 = vld [vmem:[%s528_s9] sm:$0xff]  ;;  %v287_v6 = vmul.f32 %v442_v0, %v272_v3  ;;  %v288_v8 = vmul.f32 %v442_v0, %v273_v5  ;;  %v311_v9 = vld [vmem:[%s528_s9 + $0x8] sm:$0xff]  ;;  %v312_v11 = vld [vmem:[%s528_s9 + $0x10] sm:$0xff]  ;;  %v289_v13 = vmul.f32 %v442_v0, %v274_v10 }
  0x12   : > { %v325_v7 = vmul.f32 %v444_v1, %v310_v4  ;;  %v326_v12 = vmul.f32 %v444_v1, %v311_v9  ;;  %v327_v14 = vmul.f32 %v444_v1, %v312_v11  ;;  %v275_v15 = vld [vmem:[%s522_s30 + $0x18] sm:$0xff]  ;;  %v276_v17 = vld [vmem:[%s522_s30 + $0x20] sm:$0xff]  ;;  %v277_v23 = vld [vmem:[%s522_s30 + $0x28] sm:$0xff] }
  0x13   : > { %v313_v16 = vld [vmem:[%s528_s9 + $0x18] sm:$0xff]  ;;  %v302_v18 = vadd.f32 %v443_v2, %v287_v6  ;;  %v303_v19 = vadd.f32 %v443_v2, %v288_v8  ;;  %v290_v20 = vmul.f32 %v442_v0, %v275_v15  ;;  %v314_v22 = vld [vmem:[%s528_s9 + $0x20] sm:$0xff]  ;;  %v315_v24 = vld [vmem:[%s528_s9 + $0x28] sm:$0xff]  ;;  %v304_v26 = vadd.f32 %v443_v2, %v289_v13 }
  0x14   : > { %v328_v21 = vmul.f32 %v444_v1, %v313_v16  ;;  %v291_v27 = vmul.f32 %v442_v0, %v276_v17  ;;  %v329_v28 = vmul.f32 %v444_v1, %v314_v22  ;;  %v292_v29 = vmul.f32 %v442_v0, %v277_v23  ;;  %v278_v30 = vld [vmem:[%s522_s30 + $0x30] sm:$0xff]  ;;  %v279_v40 = vld [vmem:[%s522_s30 + $0x38] sm:$0xff] }
  0x15   : > { %v316_v31 = vld [vmem:[%s528_s9 + $0x30] sm:$0xff]  ;;  %v333_v32 = vadd.f32 %v325_v7, %v302_v18  ;;  %v334_v33 = vadd.f32 %v326_v12, %v303_v19  ;;  %v305_v34 = vadd.f32 %v443_v2, %v290_v20  ;;  %v330_v35 = vmul.f32 %v444_v1, %v315_v24  ;;  %v317_v41 = vld [vmem:[%s528_s9 + $0x38] sm:$0xff] }
  0x16   : > { %v335_v36 = vadd.f32 %v327_v14, %v304_v26  ;;  %v306_v37 = vadd.f32 %v443_v2, %v291_v27  ;;  %v307_v38 = vadd.f32 %v443_v2, %v292_v29  ;;  %v293_v39 = vmul.f32 %v442_v0, %v278_v30 }
  0x17   : > { %v348_v42 = vadd.f32 %v445_v25, %v333_v32  ;;  %v349_v43 = vadd.f32 %v445_v25, %v334_v33  ;;  %v336_v44 = vadd.f32 %v328_v21, %v305_v34  ;;  %v331_v45 = vmul.f32 %v444_v1, %v316_v31 }
  0x18   : > { %v350_v46 = vadd.f32 %v445_v25, %v335_v36  ;;  %v337_v47 = vadd.f32 %v329_v28, %v306_v37  ;;  %v338_v48 = vadd.f32 %v330_v35, %v307_v38  ;;  %v308_v49 = vadd.f32 %v443_v2, %v293_v39 }
  0x19   : > { %356 = vst [vmem:[%s554_s16] sm:$0xff] %v348_v42  ;;  %357 = vst [vmem:[%s554_s16 + $0x8] sm:$0xff] %v349_v43  ;;  %v351_v50 = vadd.f32 %v445_v25, %v336_v44  ;;  %v294_v51 = vmul.f32 %v442_v0, %v279_v40  ;;  %v332_v52 = vmul.f32 %v444_v1, %v317_v41 }
  0x1a   : > { %358 = vst [vmem:[%s554_s16 + $0x10] sm:$0xff] %v350_v46  ;;  %v352_v53 = vadd.f32 %v445_v25, %v337_v47  ;;  %v353_v54 = vadd.f32 %v445_v25, %v338_v48  ;;  %v339_v55 = vadd.f32 %v331_v45, %v308_v49 }
  0x1b   : > { %359 = vst [vmem:[%s554_s16 + $0x18] sm:$0xff] %v351_v50  ;;  %v309_v56 = vadd.f32 %v443_v2, %v294_v51 }
  0x1c   : > { %360 = vst [vmem:[%s554_s16 + $0x20] sm:$0xff] %v352_v53  ;;  %361 = vst [vmem:[%s554_s16 + $0x28] sm:$0xff] %v353_v54  ;;  %v354_v57 = vadd.f32 %v445_v25, %v339_v55 }
  0x1d   : > { %v340_v58 = vadd.f32 %v332_v52, %v309_v56 }
  0x1e   : > { %362 = vst [vmem:[%s554_s16 + $0x30] sm:$0xff] %v354_v57 }
  0x1f   : > { %v355_v59 = vadd.f32 %v445_v25, %v340_v58 }
  0x21   : > { %363 = vst [vmem:[%s554_s16 + $0x38] sm:$0xff] %v355_v59 }
  0x22 PF: > { %s16_s21 = sadd.s32 1, %s465_s21  }
  0x23   : > { %p13_p4 = scmp.ge.s32.totalorder %s16_s21, 4  }
  0x25   :  { %15 = sbr.rel (!%p13_p4) target bundleno = 1 (0x1), region = 77 }

// kernel: basic_block_forward.4
= control target key start
LH: loop header
LB: loop body
LE: loop exit
PB: predicated region body
PF: predicated region fallthrough
CT: control target
= control target key end

     0   :  { %s3122_s17 = smov 0   ;;  %s3598_s0 = inlined_call_operand.vmem [shape: f32[2,64,128], index: 0, kind: input, shape index: {}]   ;;  %s3599_s1 = inlined_call_operand.vmem [shape: f32[1,128], index: 1, kind: input, shape index: {}]   ;;  %s3600_s2 = inlined_call_operand.vmem [shape: f32[1,128], index: 2, kind: input, shape index: {}]   ;;  %s3601_s3 = inlined_call_operand.vmem [shape: bf16[9,128,128], index: 3, kind: input, shape index: {}]   ;;  %s3602_s4 = inlined_call_operand.vmem [shape: bf16[2,64,128], index: 4, kind: input, shape index: {}]   ;;  %s3603_s5 = inlined_call_operand.vmem [shape: bf16[128,128], index: 5, kind: input, shape index: {}]   ;;  %s3604_s6 = inlined_call_operand.vmem [shape: f32[2,64,128], index: 6, kind: output, shape index: {0}]   ;;  %s3605_s7 = inlined_call_operand.vmem [shape: f32[2,1,128], index: 7, kind: output, shape index: {1}]   ;;  %s3606_s8 = inlined_call_operand.vmem [shape: f32[2,1,128], index: 8, kind: output, shape index: {2}]   ;;  %s3607_s9 = inlined_call_operand.vmem [shape: f32[2,64,128], index: 9, kind: output, shape index: {3}]   ;;  %s3608_s10 = inlined_call_operand.vmem [shape: f32[2,1,128], index: 10, kind: output, shape index: {4}]   ;;  %s3609_s11 = inlined_call_operand.vmem [shape: f32[2,1,128], index: 11, kind: output, shape index: {5}]  }
   0x1 LB: > { %s2303_s18 = sadd.s32 4294967295, %s3059_s17   ;;  %p2307_p0 = scmp.ge.s32.totalorder %s3059_s17, 1  ;;  %s3059_s17 = sphi %s3122_s17, %s22_s17  }
   0x2   : > { %p358_p1 = scmp.lt.s32.totalorder %s3059_s17, 3 }
   0x4   : > { %p359_p2 = pnand %p2307_p0, %p358_p1 }
   0x5   : > { %v2969_v0 = vld [vmem:[%s3601_s3 + $0x40] sm:$0xff] (!%p359_p2)   ;;  %v2971_v2 = vld [vmem:[%s3601_s3 + $0x48] sm:$0xff] (!%p359_p2)   ;;  %p3141_p3 = scmp.lt.s32.totalorder (!%p359_p2), %s2303_s18, 1  ;;  %v3061_v3 = vmov (!%p359_p2), 0.0   ;;  %v2973_v5 = vld [vmem:[%s3601_s3 + $0x50] sm:$0xff] (!%p359_p2)  }
   0x6   : > { %362 = sbr.rel (%p359_p2) target bundleno = 413 (0x19d), region = 44  ;;  %v2970_v1 = vld [vmem:[%s3601_s3 + $0x100] sm:$0xff] (!%p359_p2)   ;;  %2656 = vmatprep.subr.bf16.mxu1 (!%p359_p2), %v2969_v0  ;;  %491 = vst [vmem:[#allocation2] sm:$0xff] (!%p359_p2), %v3061_v3  ;;  %492 = vst [vmem:[#allocation2 + $0x8] sm:$0x3] (!%p359_p2), %v3061_v3  ;;  %v2972_v4 = vld [vmem:[%s3601_s3 + $0x108] sm:$0xff] (!%p359_p2)  }
   0x7   : > { %493 = vst [vmem:[#allocation2 + $0x10] sm:$0xff] (!%p359_p2), %v3061_v3  ;;  %494 = vst [vmem:[#allocation2 + $0x18] sm:$0x3] (!%p359_p2), %v3061_v3  ;;  %2752 = vmatprep.subr.bf16.mxu0 (!%p359_p2), %v2970_v1  ;;  %2657 = vmatpush3.bf16.msra.mxu1 (!%p359_p2), %v2969_v0  ;;  %v2974_v6 = vld [vmem:[%s3601_s3 + $0x110] sm:$0xff] (!%p359_p2)   ;;  %v2975_v7 = vld [vmem:[%s3601_s3 + $0x58] sm:$0xff] (!%p359_p2)  }
   0x8   : > { %495 = vst [vmem:[#allocation2 + $0x20] sm:$0xff] (!%p359_p2), %v3061_v3  ;;  %496 = vst [vmem:[#allocation2 + $0x28] sm:$0x3] (!%p359_p2), %v3061_v3  ;;  %2753 = vmatpush3.bf16.msra.mxu0 (!%p359_p2), %v2970_v1  ;;  %2658 = vmatprep.subr.bf16.mxu1 (!%p359_p2), %v2971_v2  ;;  %v2976_v8 = vld [vmem:[%s3601_s3 + $0x118] sm:$0xff] (!%p359_p2)   ;;  %v2977_v9 = vld [vmem:[%s3601_s3 + $0x60] sm:$0xff] (!%p359_p2)  }
   0x9   : > { %497 = vst [vmem:[#allocation2 + $0x30] sm:$0xff] (!%p359_p2), %v3061_v3  ;;  %498 = vst [vmem:[#allocation2 + $0x38] sm:$0x3] (!%p359_p2), %v3061_v3  ;;  %2754 = vmatprep.subr.bf16.mxu0 (!%p359_p2), %v2972_v4  ;;  %v2978_v10 = vld [vmem:[%s3601_s3 + $0x120] sm:$0xff] (!%p359_p2)   ;;  %v2979_v11 = vld [vmem:[%s3601_s3 + $0x68] sm:$0xff] (!%p359_p2)  }
   0xa   : > { %499 = vst [vmem:[#allocation2 + $0x40] sm:$0xff] (!%p359_p2), %v3061_v3  ;;  %500 = vst [vmem:[#allocation2 + $0x48] sm:$0x3] (!%p359_p2), %v3061_v3  ;;  %v2316_v13 = vld [vmem:[%s3599_s1] ss:$0 sm:$0xff] (!%p359_p2)  ;;  %v2980_v15 = vld [vmem:[%s3601_s3 + $0x128] sm:$0xff] (!%p359_p2)  }
   0xb   : > { %501 = vst [vmem:[#allocation2 + $0x50] sm:$0xff] (!%p359_p2), %v3061_v3  ;;  %502 = vst [vmem:[#allocation2 + $0x58] sm:$0x3] (!%p359_p2), %v3061_v3  ;;  %2659 = vmatpush3.bf16.msra.mxu1 (!%p359_p2), %v2971_v2  ;;  %v3211_v14 = vld [vmem:[%s3600_s2] ss:$0 sm:$0xff] (!%p359_p2)  ;;  %v2981_v19 = vld [vmem:[%s3601_s3 + $0x70] sm:$0xff] (!%p359_p2)  }
   0xc   : > { %503 = vst [vmem:[#allocation2 + $0x60] sm:$0xff] (!%p359_p2), %v3061_v3  ;;  %504 = vst [vmem:[#allocation2 + $0x68] sm:$0x3] (!%p359_p2), %v3061_v3  ;;  %2755 = vmatpush3.bf16.msra.mxu0 (!%p359_p2), %v2972_v4  ;;  %2660 = vmatprep.subr.bf16.mxu1 (!%p359_p2), %v2973_v5  ;;  %v2982_v25 = vld [vmem:[%s3601_s3 + $0x130] sm:$0xff] (!%p359_p2)   ;;  %v2983_v32 = vld [vmem:[%s3601_s3 + $0x78] sm:$0xff] (!%p359_p2)  }
   0xd   : > { %505 = vst [vmem:[#allocation2 + $0x70] sm:$0xff] %v3061_v3  ;;  %506 = vst [vmem:[#allocation2 + $0x78] sm:$0x3] %v3061_v3  ;;  %s3612_s18 = smov (!%p3141_p3, %s2303_s18), 1  ;;  %2756 = vmatprep.subr.bf16.mxu0 %v2974_v6  ;;  %v548_v17 = vld [vmem:[#allocation2 + $0x1] sm:$0xff]  ;;  %v2984_v33 = vld [vmem:[%s3601_s3 + $0x138] sm:$0xff]  }
   0xe   : > { %507 = vst [vmem:[#allocation2 + $0x80] sm:$0xff] %v3061_v3  ;;  %508 = vst [vmem:[#allocation2 + $0x88] sm:$0x3] %v3061_v3  ;;  %s3187_s19 = sshll.u32 %s3612_s18, 6  ;;  %v2985_v34 = vld [vmem:[%s3601_s3] sm:$0xff]   ;;  %v2987_v39 = vld [vmem:[%s3601_s3 + $0x8] sm:$0xff]   ;;  %s448_s25 = scalar_lea.vmem %s3608_s10, %s3612_s18 }
   0xf   : > { %509 = vst [vmem:[#allocation2 + $0x90] sm:$0xff] %v3061_v3  ;;  %510 = vst [vmem:[#allocation2 + $0x98] sm:$0x3] %v3061_v3  ;;  %2661 = vmatpush3.bf16.msra.mxu1 %v2973_v5  ;;  %s3199_s26 = scalar_lea.vmem %s3598_s0, %s3187_s19  ;;  %v2986_v35 = vld [vmem:[%s3601_s3 + $0x140] sm:$0xff]   ;;  %v2988_v42 = vld [vmem:[%s3601_s3 + $0x148] sm:$0xff]   ;;  %s2533_s23 = sshll.u32 %s3612_s18, 5 }
  0x10   : > { %2757 = vmatpush3.bf16.msra.mxu0 %v2974_v6  ;;  %2662 = vmatprep.subr.bf16.mxu1 %v2975_v7  ;;  %v453_v12 = vld [vmem:[%s3199_s26] sm:$0xff]  ;;  %v454_v18 = vld [vmem:[%s3199_s26 + $0x8] sm:$0xff]  ;;  %v455_v22 = vld [vmem:[%s3199_s26 + $0x10] sm:$0xff]  ;;  %s3406_s29 = scalar_lea.vmem %s3602_s4, %s2533_s23  ;;  %s3560_s23 = scalar_lea.vmem %s3604_s6, %s3187_s19 }
  0x11   : > { %2758 = vmatprep.subr.bf16.mxu0 %v2976_v8  ;;  %v468_v16 = vmul.f32 %v2316_v13, %v453_v12  ;;  %v469_v21 = vmul.f32 %v2316_v13, %v454_v18  ;;  %v470_v23 = vmul.f32 %v2316_v13, %v455_v22  ;;  %v456_v24 = vld [vmem:[%s3199_s26 + $0x18] sm:$0xff]  ;;  %v457_v37 = vld [vmem:[%s3199_s26 + $0x20] sm:$0xff]  ;;  %v458_v41 = vld [vmem:[%s3199_s26 + $0x28] sm:$0xff]  ;;  %s437_s30 = scalar_lea.vmem %s3605_s7, %s3612_s18  ;;  %s451_s14 = scalar_lea.vmem %s3609_s11, %s3612_s18 }
  0x12   : > { %v471_v28 = vmul.f32 %v2316_v13, %v456_v24  ;;  %v472_v40 = vmul.f32 %v2316_v13, %v457_v37  ;;  %v473_v43 = vmul.f32 %v2316_v13, %v458_v41  ;;  %v459_v45 = vld [vmem:[%s3199_s26 + $0x30] sm:$0xff]  ;;  %v460_v46 = vld [vmem:[%s3199_s26 + $0x38] sm:$0xff]  ;;  %v2993_v1 = vld [vmem:[%s3601_s3 + $0x20] sm:$0xff]   ;;  %s3554_s26 = scalar_lea.vmem %s3607_s9, %s3187_s19  ;;  %s440_s20 = scalar_lea.vmem %s3606_s8, %s3612_s18 }
  0x13   : > { %2663 = vmatpush3.bf16.msra.mxu1 %v2975_v7  ;;  %v483_v20 = vadd.f32 %v3211_v14, %v468_v16  ;;  %v484_v27 = vadd.f32 %v3211_v14, %v469_v21  ;;  %v485_v29 = vadd.f32 %v3211_v14, %v470_v23  ;;  %v474_v48 = vmul.f32 %v2316_v13, %v459_v45  ;;  %v2989_v51 = vld [vmem:[%s3601_s3 + $0x10] sm:$0xff]   ;;  %v2991_v61 = vld [vmem:[%s3601_s3 + $0x18] sm:$0xff]   ;;  %v2994_v2 = vld [vmem:[%s3601_s3 + $0x160] sm:$0xff]  }
  0x14   : > { %2759 = vmatpush3.bf16.msra.mxu0 %v2976_v8  ;;  %2664 = vmatprep.subr.bf16.mxu1 %v2977_v9  ;;  %v486_v31 = vadd.f32 %v3211_v14, %v471_v28  ;;  %v487_v44 = vadd.f32 %v3211_v14, %v472_v40  ;;  %v488_v47 = vadd.f32 %v3211_v14, %v473_v43  ;;  %v2990_v55 = vld [vmem:[%s3601_s3 + $0x150] sm:$0xff]   ;;  %v2992_v62 = vld [vmem:[%s3601_s3 + $0x158] sm:$0xff]   ;;  %v2995_v4 = vld [vmem:[%s3601_s3 + $0x28] sm:$0xff]  }
  0x15   : > { %2760 = vmatprep.subr.bf16.mxu0 %v2978_v10  ;;  %512 = vst [vmem:[#allocation2 + $0x11] sm:$0xff] %v483_v20  ;;  %v556_v26 = vpack.c.bf16 %v483_v20, %v548_v17  ;;  %513 = vst [vmem:[#allocation2 + $0x21] sm:$0xff] %v484_v27  ;;  %v1111_v30 = vpack.c.bf16 %v484_v27, %v483_v20  ;;  %v3241_v36 = vpack.c.bf16 %v485_v29, %v484_v27  ;;  %v2996_v5 = vld [vmem:[%s3601_s3 + $0x168] sm:$0xff]   ;;  %v2997_v6 = vld [vmem:[%s3601_s3 + $0x30] sm:$0xff]  }
  0x16   : > { %514 = vst [vmem:[#allocation2 + $0x31] sm:$0xff] %v485_v29  ;;  %515 = vst [vmem:[#allocation2 + $0x41] sm:$0xff] %v486_v31  ;;  %v1112_v38 = vpack.c.bf16 %v486_v31, %v485_v29  ;;  %v475_v49 = vmul.f32 %v2316_v13, %v460_v46  ;;  %v3256_v50 = vpack.c.bf16 %v487_v44, %v486_v31  ;;  %v2998_v7 = vld [vmem:[%s3601_s3 + $0x170] sm:$0xff]   ;;  %v2999_v8 = vld [vmem:[%s3601_s3 + $0x38] sm:$0xff]  }
  0x17   : > { %2665 = vmatpush3.bf16.msra.mxu1 %v2977_v9  ;;  %2672 = vmatprep.mubr.bf16.mxu1 %v556_v26  ;;  %516 = vst [vmem:[#allocation2 + $0x51] sm:$0xff] %v487_v44  ;;  %517 = vst [vmem:[#allocation2 + $0x61] sm:$0xff] %v488_v47  ;;  %v1113_v52 = vpack.c.bf16 %v488_v47, %v487_v44  ;;  %v489_v53 = vadd.f32 %v3211_v14, %v474_v48  ;;  %v3000_v9 = vld [vmem:[%s3601_s3 + $0x178] sm:$0xff]   ;;  %v3001_v12 = vld [vmem:[%s3601_s3 + $0x80] sm:$0xff]  }
  0x18   : > { %2761 = vmatpush3.bf16.msra.mxu0 %v2978_v10  ;;  %2666 = vmatprep.subr.bf16.mxu1 %v2979_v11  ;;  %v3263_v54 = vadd.f32 %v3211_v14, %v475_v49  ;;  %v3002_v14 = vld [vmem:[%s3601_s3 + $0x180] sm:$0xff]   ;;  %v3004_v23 = vld [vmem:[%s3601_s3 + $0x188] sm:$0xff]   ;;  %v3005_v26 = vld [vmem:[%s3601_s3 + $0x90] sm:$0xff]  }
  0x19   : > { %2762 = vmatprep.subr.bf16.mxu0 %v2980_v15  ;;  %2768 = vmatprep.mubr.bf16.mxu0 %v1111_v30  ;;  %518 = vst [vmem:[#allocation2 + $0x71] sm:$0xff] %v489_v53  ;;  %v3269_v56 = vpack.c.bf16 %v489_v53, %v488_v47  ;;  %v3006_v31 = vld [vmem:[%s3601_s3 + $0x190] sm:$0xff]   ;;  %v3008_v37 = vld [vmem:[%s3601_s3 + $0x198] sm:$0xff]   ;;  %v3010_v40 = vld [vmem:[%s3601_s3 + $0x1a0] sm:$0xff]  }
  0x1a   : > { %519 = vst [vmem:[#allocation2 + $0x81] sm:$0xff] %v3263_v54  ;;  %v1114_v58 = vpack.c.bf16 %v3263_v54, %v489_v53  ;;  %v3011_v41 = vld [vmem:[%s3601_s3 + $0xa8] sm:$0xff]   ;;  %v3013_v43 = vld [vmem:[%s3601_s3 + $0xb0] sm:$0xff]   ;;  %v3015_v45 = vld [vmem:[%s3601_s3 + $0xb8] sm:$0xff]  }
  0x1b   : > { %2667 = vmatpush3.bf16.msra.mxu1 %v2979_v11  ;;  %v3014_v44 = vld [vmem:[%s3601_s3 + $0x1b0] sm:$0xff]   ;;  %v3016_v46 = vld [vmem:[%s3601_s3 + $0x1b8] sm:$0xff]   ;;  %v3017_v47 = vld [vmem:[%s3601_s3 + $0xc0] sm:$0xff]  }
  0x1c   : > { %2763 = vmatpush3.bf16.msra.mxu0 %v2980_v15  ;;  %2668 = vmatprep.subr.bf16.mxu1 %v2981_v19  ;;  %v3272_v57 = vld [vmem:[#allocation2 + $0x10] sm:$0xff]  ;;  %v3277_v60 = vld [vmem:[#allocation2 + $0x22] sm:$0xff] }
  0x1d   : > { %2764 = vmatprep.subr.bf16.mxu0 %v2982_v25  ;;  %v3275_v59 = vld [vmem:[#allocation2 + $0x12] sm:$0xff]  ;;  %v528_v63 = vpack.c.bf16 %v3272_v57, %v3061_v3  ;;  %v3314_v10 = vld [vmem:[#allocation2 + $0x20] sm:$0xff] }
  0x1e   : > { %v1261_v0 = vpack.c.bf16 %v3277_v60, %v3275_v59  ;;  %v3316_v11 = vld [vmem:[#allocation2 + $0x30] sm:$0xff]  ;;  %v3326_v15 = vld [vmem:[#allocation2 + $0x42] sm:$0xff] }
  0x1f   : > { %2669 = vmatpush3.bf16.msra.mxu1 %v2981_v19  ;;  %v3321_v13 = vld [vmem:[#allocation2 + $0x32] sm:$0xff]  ;;  %v3328_v16 = vld [vmem:[#allocation2 + $0x40] sm:$0xff]  ;;  %v529_v18 = vpack.c.bf16 %v3316_v11, %v3314_v10  ;;  %v3003_v19 = vld [vmem:[%s3601_s3 + $0x88] sm:$0xff]  }
  0x20   : > { %2765 = vmatpush3.bf16.msra.mxu0 %v2982_v25  ;;  %2670 = vmatprep.subr.bf16.mxu1 %v2983_v32  ;;  %v3330_v17 = vld [vmem:[#allocation2 + $0x50] sm:$0xff]  ;;  %v1262_v21 = vpack.c.bf16 %v3326_v15, %v3321_v13  ;;  %v3341_v22 = vld [vmem:[#allocation2 + $0x62] sm:$0xff]  ;;  %v3419_v49 = vpack.c.bf16 %v3321_v13, %v3277_v60 }
  0x21   : > { %2766 = vmatprep.subr.bf16.mxu0 %v2984_v33  ;;  %v3337_v20 = vld [vmem:[#allocation2 + $0x52] sm:$0xff]  ;;  %v3348_v24 = vpack.c.bf16 %v3330_v17, %v3328_v16  ;;  %v3350_v25 = vld [vmem:[#allocation2 + $0x60] sm:$0xff] }
  0x22   : > { %v1263_v27 = vpack.c.bf16 %v3341_v22, %v3337_v20  ;;  %v3357_v28 = vld [vmem:[#allocation2 + $0x70] sm:$0xff]  ;;  %v3361_v30 = vld [vmem:[#allocation2 + $0x82] sm:$0xff]  ;;  %v3429_v53 = vpack.c.bf16 %v3337_v20, %v3326_v15  ;;  %v963_v13 = vpack.c.bf16 %v3350_v25, %v3330_v17  ;;  %v3040_v17 = vld [vmem:[%s3603_s5 + $0x18] sm:$0xff]  }
  0x23   : > { %2671 = vmatpush3.bf16.msra.mxu1 %v2983_v32  ;;  %v3359_v29 = vld [vmem:[#allocation2 + $0x72] sm:$0xff]  ;;  %v3369_v32 = vpack.c.bf16 %v3357_v28, %v3350_v25  ;;  %v3018_v48 = vld [vmem:[%s3601_s3 + $0x1c0] sm:$0xff]   ;;  %v3044_v20 = vld [vmem:[%s3603_s5 + $0x28] sm:$0xff]  }
  0x24   : > { %2767 = vmatpush3.bf16.msra.mxu0 %v2984_v33  ;;  %2680 = vmatprep.subr.bf16.mxu1 %v2985_v34  ;;  %v803_v33 = vld [vmem:[#allocation2 + $0x2] sm:$0xff]  ;;  %v3444_v60 = vpack.c.bf16 %v3359_v29, %v3341_v22  ;;  %v3037_v15 = vld [vmem:[%s3601_s3 + $0x210] sm:$0xff]   ;;  %v3047_v25 = vld [vmem:[%s3601_s3 + $0x238] sm:$0xff]  }
  0x25   : > { %2776 = vmatprep.subr.bf16.mxu0 %v2986_v35  ;;  %v3046_v22 = vld [vmem:[%s3603_s5 + $0x30] sm:$0xff]  }
  0x26   : > { %2673 = vmatmul.mubr.bf16.vlgmr.msra.gmra.mrb[0].mxu1 %v3241_v36 }
  0x27   : > { %2681 = vmatpush3.bf16.msra.mxu1 %v2985_v34  ;;  %2769 = vmatmul.mubr.bf16.vlgmr.msra.gmra.mrb[0].mxu0 %v1112_v38  ;;  %v1264_v34 = vpack.c.bf16 %v3361_v30, %v3359_v29  ;;  %v811_v38 = vpack.c.bf16 %v3275_v59, %v803_v33  ;;  %v3022_v59 = vld [vmem:[%s3601_s3 + $0x1d0] sm:$0xff]   ;;  %v3052_v29 = vld [vmem:[%s3406_s29 + $0x18] sm:$0xff]  }
  0x28   : > { %2777 = vmatpush3.bf16.msra.mxu0 %v2986_v35  ;;  %2682 = vmatprep.subr.bf16.mxu1 %v2987_v39  ;;  %v3007_v35 = vld [vmem:[%s3601_s3 + $0x98] sm:$0xff]  }
  0x29   : > { %2778 = vmatprep.subr.bf16.mxu0 %v2988_v42  ;;  %2676 = vmatprep.mubr.bf16.mxu1 %v3256_v50 }
  0x2a   : > { %2772 = vmatprep.mubr.bf16.mxu0 %v1113_v52  ;;  %v3020_v52 = vld [vmem:[%s3601_s3 + $0x1c8] sm:$0xff]  }
  0x2b   : > { %2683 = vmatpush3.bf16.msra.mxu1 %v2987_v39  ;;  %v3009_v39 = vld [vmem:[%s3601_s3 + $0xa0] sm:$0xff]  }
  0x2c   : > { %2779 = vmatpush3.bf16.msra.mxu0 %v2988_v42  ;;  %2684 = vmatprep.subr.bf16.mxu1 %v2989_v51  ;;  %v3012_v42 = vld [vmem:[%s3601_s3 + $0x1a8] sm:$0xff]  }
  0x2d   : > { %2780 = vmatprep.subr.bf16.mxu0 %v2990_v55 }
  0x2e   : > { %2677 = vmatmul.mubr.bf16.gmra.mrb[4].mxu1 %v3269_v56 }
  0x2f   : > { %2685 = vmatpush3.bf16.msra.mxu1 %v2989_v51  ;;  %2773 = vmatmul.mubr.bf16.gmra.mrb[4].mxu0 %v1114_v58  ;;  %v3019_v51 = vld [vmem:[%s3601_s3 + $0xc8] sm:$0xff]   ;;  %v3436_v58 = vld [vmem:[#allocation2 + $0x80] sm:$0xff] }
  0x30   : > { %2781 = vmatpush3.bf16.msra.mxu0 %v2990_v55  ;;  %2686 = vmatprep.subr.bf16.mxu1 %v2991_v61  ;;  %v3021_v55 = vld [vmem:[%s3601_s3 + $0xd0] sm:$0xff]  }
  0x31   : > { %2782 = vmatprep.subr.bf16.mxu0 %v2992_v62  ;;  %2696 = vmatprep.mubr.bf16.mxu1 %v528_v63  ;;  %v3024_v63 = vld [vmem:[%s3601_s3 + $0x1d8] sm:$0xff]  }
  0x32   : > { %2792 = vmatprep.mubr.bf16.mxu0 %v1261_v0  ;;  %v961_v0 = vpack.c.bf16 %v3314_v10, %v3272_v57  ;;  %v3027_v57 = vld [vmem:[%s3601_s3 + $0xe8] sm:$0xff]  }
  0x33   : > { %2687 = vmatpush3.bf16.msra.mxu1 %v2991_v61  ;;  %v1415_v61 = vpack.c.bf16 %v3061_v3, %v3436_v58  ;;  %v3025_v3 = vld [vmem:[%s3601_s3 + $0xe0] sm:$0xff]   ;;  %v3036_v10 = vld [vmem:[%s3603_s5 + $0x8] sm:$0xff]  }
  0x34   : > { %2783 = vmatpush3.bf16.msra.mxu0 %v2992_v62  ;;  %2688 = vmatprep.subr.bf16.mxu1 %v2993_v1  ;;  %v3023_v62 = vld [vmem:[%s3601_s3 + $0xd8] sm:$0xff]  }
  0x35   : > { %2784 = vmatprep.subr.bf16.mxu0 %v2994_v2 }
  0x37   : > { %2689 = vmatpush3.bf16.msra.mxu1 %v2993_v1  ;;  %v3026_v1 = vld [vmem:[%s3601_s3 + $0x1e0] sm:$0xff]  }
  0x38   : > { %2785 = vmatpush3.bf16.msra.mxu0 %v2994_v2  ;;  %2690 = vmatprep.subr.bf16.mxu1 %v2995_v4  ;;  %v3028_v2 = vld [vmem:[%s3601_s3 + $0x1e8] sm:$0xff]  }
  0x39   : > { %2786 = vmatprep.subr.bf16.mxu0 %v2996_v5 }
  0x3b   : > { %2691 = vmatpush3.bf16.msra.mxu1 %v2995_v4  ;;  %v3029_v4 = vld [vmem:[%s3601_s3 + $0xf0] sm:$0xff]  }
  0x3c   : > { %2787 = vmatpush3.bf16.msra.mxu0 %v2996_v5  ;;  %2692 = vmatprep.subr.bf16.mxu1 %v2997_v6  ;;  %v3031_v5 = vld [vmem:[%s3601_s3 + $0xf8] sm:$0xff]  }
  0x3d   : > { %2788 = vmatprep.subr.bf16.mxu0 %v2998_v7 }
  0x3f   : > { %2693 = vmatpush3.bf16.msra.mxu1 %v2997_v6  ;;  %v3032_v6 = vld [vmem:[%s3601_s3 + $0x1f8] sm:$0xff]  }
  0x40   : > { %2789 = vmatpush3.bf16.msra.mxu0 %v2998_v7  ;;  %2694 = vmatprep.subr.bf16.mxu1 %v2999_v8  ;;  %v3034_v7 = vld [vmem:[%s3603_s5] sm:$0xff]  }
  0x41   : > { %2790 = vmatprep.subr.bf16.mxu0 %v3000_v9 }
  0x43   : > { %2695 = vmatpush3.bf16.msra.mxu1 %v2999_v8  ;;  %v3033_v8 = vld [vmem:[%s3601_s3 + $0x200] sm:$0xff]  }
  0x44   : > { %2791 = vmatpush3.bf16.msra.mxu0 %v3000_v9  ;;  %2704 = vmatprep.subr.bf16.mxu1 %v3001_v12  ;;  %v962_v9 = vpack.c.bf16 %v3328_v16, %v3316_v11  ;;  %v3038_v11 = vld [vmem:[%s3603_s5 + $0x10] sm:$0xff]   ;;  %v964_v16 = vpack.c.bf16 %v3436_v58, %v3357_v28 }
  0x45   : > { %2800 = vmatprep.subr.bf16.mxu0 %v3002_v14  ;;  %v1711_v28 = vld [vmem:[#allocation2 + $0x92] sm:$0xff] }
  0x46   : > { %2697 = vmatmul.mubr.bf16.vlgmr.msra.gmra.mrb[0].mxu1 %v529_v18 }
  0x47   : > { %2705 = vmatpush3.bf16.msra.mxu1 %v3001_v12  ;;  %2793 = vmatmul.mubr.bf16.vlgmr.msra.gmra.mrb[0].mxu0 %v1262_v21  ;;  %v3035_v12 = vld [vmem:[%s3601_s3 + $0x208] sm:$0xff]  }
  0x48   : > { %2801 = vmatpush3.bf16.msra.mxu0 %v3002_v14  ;;  %2706 = vmatprep.subr.bf16.mxu1 %v3003_v19  ;;  %v1561_v14 = vld [vmem:[#allocation2 + $0x91] sm:$0xff]  ;;  %v3043_v21 = vld [vmem:[%s3601_s3 + $0x228] sm:$0xff]  }
  0x49   : > { %2802 = vmatprep.subr.bf16.mxu0 %v3004_v23  ;;  %2700 = vmatprep.mubr.bf16.mxu1 %v3348_v24 }
  0x4a   : > { %2796 = vmatprep.mubr.bf16.mxu0 %v1263_v27  ;;  %v3051_v27 = vld [vmem:[%s3406_s29 + $0x10] sm:$0xff]  }
  0x4b   : > { %2707 = vmatpush3.bf16.msra.mxu1 %v3003_v19  ;;  %v3049_v19 = vld [vmem:[%s3406_s29] sm:$0xff]  }
  0x4c   : > { %2803 = vmatpush3.bf16.msra.mxu0 %v3004_v23  ;;  %2708 = vmatprep.subr.bf16.mxu1 %v3005_v26  ;;  %v3045_v23 = vld [vmem:[%s3601_s3 + $0x230] sm:$0xff]  }
  0x4d   : > { %2804 = vmatprep.subr.bf16.mxu0 %v3006_v31 }
  0x4e   : > { %2701 = vmatmul.mubr.bf16.gmra.mrb[4].mxu1 %v3369_v32 }
  0x4f   : > { %2709 = vmatpush3.bf16.msra.mxu1 %v3005_v26  ;;  %2797 = vmatmul.mubr.bf16.gmra.mrb[4].mxu0 %v1264_v34  ;;  %v3050_v26 = vld [vmem:[%s3406_s29 + $0x8] sm:$0xff]  }
  0x50   : > { %2805 = vmatpush3.bf16.msra.mxu0 %v3006_v31  ;;  %2710 = vmatprep.subr.bf16.mxu1 %v3007_v35  ;;  %v1715_v31 = vpack.c.bf16 %v1711_v28, %v3361_v30 }
  0x51   : > { %2806 = vmatprep.subr.bf16.mxu0 %v3008_v37  ;;  %2720 = vmatprep.mubr.bf16.mxu1 %v811_v38 }
  0x52   : > { %2816 = vmatprep.mubr.bf16.mxu0 %v529_v18  ;;  %v3039_v18 = vld [vmem:[%s3601_s3 + $0x218] sm:$0xff]  }
  0x53   : > { %2711 = vmatpush3.bf16.msra.mxu1 %v3007_v35 }
  0x54   : > { %2807 = vmatpush3.bf16.msra.mxu0 %v3008_v37  ;;  %2712 = vmatprep.subr.bf16.mxu1 %v3009_v39 }
  0x55   : > { %2808 = vmatprep.subr.bf16.mxu0 %v3010_v40 }
  0x57   : > { %2713 = vmatpush3.bf16.msra.mxu1 %v3009_v39 }
  0x58   : > { %2809 = vmatpush3.bf16.msra.mxu0 %v3010_v40  ;;  %2714 = vmatprep.subr.bf16.mxu1 %v3011_v41 }
  0x59   : > { %2810 = vmatprep.subr.bf16.mxu0 %v3012_v42 }
  0x5b   : > { %2715 = vmatpush3.bf16.msra.mxu1 %v3011_v41 }
  0x5c   : > { %2811 = vmatpush3.bf16.msra.mxu0 %v3012_v42  ;;  %2716 = vmatprep.subr.bf16.mxu1 %v3013_v43 }
  0x5d   : > { %2812 = vmatprep.subr.bf16.mxu0 %v3014_v44 }
  0x5f   : > { %2717 = vmatpush3.bf16.msra.mxu1 %v3013_v43 }
  0x60   : > { %2813 = vmatpush3.bf16.msra.mxu0 %v3014_v44  ;;  %2718 = vmatprep.subr.bf16.mxu1 %v3015_v45 }
  0x61   : > { %2814 = vmatprep.subr.bf16.mxu0 %v3016_v46 }
  0x63   : > { %2719 = vmatpush3.bf16.msra.mxu1 %v3015_v45 }
  0x64   : > { %2815 = vmatpush3.bf16.msra.mxu0 %v3016_v46  ;;  %2728 = vmatprep.subr.bf16.mxu1 %v3017_v47 }
  0x65   : > { %2824 = vmatprep.subr.bf16.mxu0 %v3018_v48 }
  0x66   : > { %2721 = vmatmul.mubr.bf16.vlgmr.msra.gmra.mrb[0].mxu1 %v3419_v49 }
  0x67   : > { %2729 = vmatpush3.bf16.msra.mxu1 %v3017_v47  ;;  %2817 = vmatmul.mubr.bf16.vlgmr.msra.gmra.mrb[0].mxu0 %v3348_v24  ;;  %v3048_v24 = vld [vmem:[%s3603_s5 + $0x38] sm:$0xff]  }
  0x68   : > { %2825 = vmatpush3.bf16.msra.mxu0 %v3018_v48  ;;  %2730 = vmatprep.subr.bf16.mxu1 %v3019_v51 }
  0x69   : > { %2826 = vmatprep.subr.bf16.mxu0 %v3020_v52  ;;  %2724 = vmatprep.mubr.bf16.mxu1 %v3429_v53 }
  0x6a   : > { %2820 = vmatprep.mubr.bf16.mxu0 %v3369_v32 }
  0x6b   : > { %2731 = vmatpush3.bf16.msra.mxu1 %v3019_v51 }
  0x6c   : > { %2827 = vmatpush3.bf16.msra.mxu0 %v3020_v52  ;;  %2732 = vmatprep.subr.bf16.mxu1 %v3021_v55 }
  0x6d   : > { %2828 = vmatprep.subr.bf16.mxu0 %v3022_v59 }
  0x6e   : > { %2725 = vmatmul.mubr.bf16.gmra.mrb[4].mxu1 %v3444_v60 }
  0x6f   : > { %2733 = vmatpush3.bf16.msra.mxu1 %v3021_v55  ;;  %2821 = vmatmul.mubr.bf16.gmra.mrb[4].mxu0 %v1415_v61 }
  0x70   : > { %2829 = vmatpush3.bf16.msra.mxu0 %v3022_v59  ;;  %2734 = vmatprep.subr.bf16.mxu1 %v3023_v62 }
  0x71   : > { %2830 = vmatprep.subr.bf16.mxu0 %v3024_v63  ;;  %2744 = vmatprep.mubr.bf16.mxu1 %v961_v0 }
  0x72   : > { %2840 = vmatprep.mubr.bf16.mxu0 %v3241_v36  ;;  %v3030_v36 = vld [vmem:[%s3601_s3 + $0x1f0] sm:$0xff]  }
  0x73   : > { %2735 = vmatpush3.bf16.msra.mxu1 %v3023_v62 }
  0x74   : > { %2831 = vmatpush3.bf16.msra.mxu0 %v3024_v63  ;;  %2736 = vmatprep.subr.bf16.mxu1 %v3025_v3 }
  0x75   : > { %2832 = vmatprep.subr.bf16.mxu0 %v3026_v1 }
  0x77   : > { %2737 = vmatpush3.bf16.msra.mxu1 %v3025_v3 }
  0x78   : > { %2833 = vmatpush3.bf16.msra.mxu0 %v3026_v1  ;;  %2738 = vmatprep.subr.bf16.mxu1 %v3027_v57 }
  0x79   : > { %2834 = vmatprep.subr.bf16.mxu0 %v3028_v2 }
  0x7b   : > { %2739 = vmatpush3.bf16.msra.mxu1 %v3027_v57 }
  0x7c   : > { %2835 = vmatpush3.bf16.msra.mxu0 %v3028_v2  ;;  %2740 = vmatprep.subr.bf16.mxu1 %v3029_v4 }
  0x7d   : > { %2836 = vmatprep.subr.bf16.mxu0 %v3030_v36 }
  0x7f   : > { %2741 = vmatpush3.bf16.msra.mxu1 %v3029_v4 }
  0x80   : > { %2837 = vmatpush3.bf16.msra.mxu0 %v3030_v36  ;;  %2742 = vmatprep.subr.bf16.mxu1 %v3031_v5 }
  0x81   : > { %2838 = vmatprep.subr.bf16.mxu0 %v3032_v6 }
  0x83   : > { %2743 = vmatpush3.bf16.msra.mxu1 %v3031_v5 }
  0x84   : > { %2839 = vmatpush3.bf16.msra.mxu0 %v3032_v6  ;;  %2872 = vmatprep.subr.bf16.mxu1 %v3034_v7 }
  0x85   : > { %2848 = vmatprep.subr.bf16.mxu0 %v3033_v8 }
  0x86   : > { %2745 = vmatmul.mubr.bf16.vlgmr.msra.gmra.mrb[0].mxu1 %v962_v9 }
  0x87   : > { %2841 = vmatmul.mubr.bf16.vlgmr.msra.gmra.mrb[0].mxu0 %v3256_v50  ;;  %2873 = vmatpush3.bf16.msra.mxu1 %v3034_v7  ;;  %v1565_v50 = vpack.c.bf16 %v1561_v14, %v3263_v54  ;;  %v3042_v54 = vld [vmem:[%s3603_s5 + $0x20] sm:$0xff]  }
  0x88   : > { %2849 = vmatpush3.bf16.msra.mxu0 %v3033_v8  ;;  %2874 = vmatprep.subr.bf16.mxu1 %v3036_v10 }
  0x89   : > { %2850 = vmatprep.subr.bf16.mxu0 %v3035_v12  ;;  %2748 = vmatprep.mubr.bf16.mxu1 %v963_v13 }
  0x8a   : > { %2844 = vmatprep.mubr.bf16.mxu0 %v3269_v56  ;;  %v3041_v56 = vld [vmem:[%s3601_s3 + $0x220] sm:$0xff]  }
  0x8b   : > { %2875 = vmatpush3.bf16.msra.mxu1 %v3036_v10 }
  0x8c   : > { %2851 = vmatpush3.bf16.msra.mxu0 %v3035_v12  ;;  %2876 = vmatprep.subr.bf16.mxu1 %v3038_v11 }
  0x8d   : > { %2852 = vmatprep.subr.bf16.mxu0 %v3037_v15 }
  0x8e   : > { %2749 = vmatmul.mubr.bf16.gmra.mrb[4].mxu1 %v964_v16 }
  0x8f   : > { %2877 = vmatpush3.bf16.msra.mxu1 %v3038_v11  ;;  %2845 = vmatmul.mubr.bf16.gmra.mrb[4].mxu0 %v1565_v50 }
  0x90   : > { %2853 = vmatpush3.bf16.msra.mxu0 %v3037_v15  ;;  %2878 = vmatprep.subr.bf16.mxu1 %v3040_v17 }
  0x91   : > { %2854 = vmatprep.subr.bf16.mxu0 %v3039_v18  ;;  %2864 = vmatprep.mubr.bf16.mxu0 %v3419_v49 }
  0x92   : > { %2888 = vmatprep.mubr.bf16.mxu1 %v3049_v19 }
  0x93   : > { %2879 = vmatpush3.bf16.msra.mxu1 %v3040_v17 }
  0x94   : > { %2855 = vmatpush3.bf16.msra.mxu0 %v3039_v18  ;;  %2880 = vmatprep.subr.bf16.mxu1 %v3042_v54 }
  0x95   : > { %2856 = vmatprep.subr.bf16.mxu0 %v3041_v56 }
  0x97   : > { %2881 = vmatpush3.bf16.msra.mxu1 %v3042_v54 }
  0x98   : > { %2857 = vmatpush3.bf16.msra.mxu0 %v3041_v56  ;;  %2882 = vmatprep.subr.bf16.mxu1 %v3044_v20 }
  0x99   : > { %2858 = vmatprep.subr.bf16.mxu0 %v3043_v21 }
  0x9b   : > { %2883 = vmatpush3.bf16.msra.mxu1 %v3044_v20 }
  0x9c   : > { %2859 = vmatpush3.bf16.msra.mxu0 %v3043_v21  ;;  %2884 = vmatprep.subr.bf16.mxu1 %v3046_v22 }
  0x9d   : > { %2860 = vmatprep.subr.bf16.mxu0 %v3045_v23 }
  0x9f   : > { %2885 = vmatpush3.bf16.msra.mxu1 %v3046_v22 }
  0xa0   : > { %2861 = vmatpush3.bf16.msra.mxu0 %v3045_v23  ;;  %2886 = vmatprep.subr.bf16.mxu1 %v3048_v24 }
  0xa1   : > { %2862 = vmatprep.subr.bf16.mxu0 %v3047_v25 }
  0xa3   : > { %2887 = vmatpush3.bf16.msra.mxu1 %v3048_v24 }
  0xa4   : > { %2863 = vmatpush3.bf16.msra.mxu0 %v3047_v25 }
  0xa6   : > { %2889 = vmatmul.mubr.bf16.vlgmr.msra.gmra.mrb[8].mxu1 %v3050_v26 }
  0xa7   : > { %2865 = vmatmul.mubr.bf16.vlgmr.msra.gmra.mrb[0].mxu0 %v3429_v53  ;;  %2892 = vmatprep.mubr.bf16.mxu1 %v3051_v27 }
  0xa8   : > { %2868 = vmatprep.mubr.bf16.mxu0 %v3444_v60 }
  0xae   : > { %2893 = vmatmul.mubr.bf16.gmra.mrb[12].mxu1 %v3052_v29 }
  0xaf   : > { %2869 = vmatmul.mubr.bf16.gmra.mrb[4].mxu0 %v1715_v31 }
 0x159   : > { %v2746_v32 = vpop.f32.mrb[0].mxu1 }
 0x15a   : > { %v1064_v33 = vpop.f32.mrb[1].mxu1 }
 0x15b   : > { %v2747_v34 = vpop.f32.mrb[2].mxu1 }
 0x15c   : > { %v1067_v35 = vpop.f32.mrb[3].mxu1 }
 0x161   : > { %v2750_v37 = vpop.f32.mrb[4].mxu1 }
 0x162   : > { %v1080_v38 = vpop.f32.mrb[5].mxu1 }
 0x163   : > { %v2751_v39 = vpop.f32.mrb[6].mxu1 }
 0x164   : > { %v3548_v40 = vpop.f32.mrb[7].mxu1 }
 0x179   : > { %v2890_v30 = vpop.f32.mrb[8].mxu1 }
 0x17a   : > { %v2866_v41 = vpop.f32.mrb[0].mxu0  ;;  %2061 = vst [vmem:[%s3554_s26 + $0x10] sm:$0xff] %v2890_v30  ;;  %v2028_v42 = vpop.f32.mrb[9].mxu1  ;;  %v2083_v59 = vmul.f32 %v2890_v30, %v2890_v30 }
 0x17b   : > { %v2896_v43 = vadd.f32 %v2866_v41, %v2746_v32  ;;  %v1815_v44 = vpop.f32.mrb[1].mxu0  ;;  %2059 = vst [vmem:[%s3554_s26] sm:$0xff] %v2028_v42  ;;  %v2081_v45 = vmul.f32 %v2028_v42, %v2028_v42  ;;  %v2891_v46 = vpop.f32.mrb[10].mxu1 }
 0x17c   : > { %v2897_v47 = vadd.f32 %v1815_v44, %v1064_v33  ;;  %v2867_v48 = vpop.f32.mrb[2].mxu0  ;;  %2062 = vst [vmem:[%s3554_s26 + $0x18] sm:$0xff] %v2891_v46  ;;  %v2031_v49 = vpop.f32.mrb[11].mxu1  ;;  %v2084_v3 = vmul.f32 %v2891_v46, %v2891_v46 }
 0x17d   : > { %1856 = vst [vmem:[%s3560_s23 + $0x10] sm:$0xff] %v2896_v43  ;;  %v2898_v51 = vadd.f32 %v2867_v48, %v2747_v34  ;;  %v1818_v52 = vpop.f32.mrb[3].mxu0  ;;  %2060 = vst [vmem:[%s3554_s26 + $0x8] sm:$0xff] %v2031_v49  ;;  %v2067_v53 = vadd.f32 %v2031_v49, %v2028_v42  ;;  %v2082_v55 = vmul.f32 %v2031_v49, %v2031_v49 }
 0x17e   : > { %1854 = vst [vmem:[%s3560_s23] sm:$0xff] %v2897_v47  ;;  %v2899_v58 = vadd.f32 %v1818_v52, %v1067_v35  ;;  %v1876_v62 = vmul.f32 %v2897_v47, %v2897_v47  ;;  %v1878_v4 = vmul.f32 %v2896_v43, %v2896_v43 }
 0x17f   : > { %1857 = vst [vmem:[%s3560_s23 + $0x18] sm:$0xff] %v2898_v51  ;;  %v2068_v60 = vadd.f32 %v2890_v30, %v2067_v53  ;;  %v2089_v61 = vadd.f32 %v2082_v55, %v2081_v45  ;;  %v1879_v14 = vmul.f32 %v2898_v51, %v2898_v51 }
 0x180   : > { %1855 = vst [vmem:[%s3560_s23 + $0x8] sm:$0xff] %v2899_v58  ;;  %v1862_v63 = vadd.f32 %v2899_v58, %v2897_v47  ;;  %v1877_v0 = vmul.f32 %v2899_v58, %v2899_v58 }
 0x181   : > { %v2090_v1 = vadd.f32 %v2089_v61, %v2083_v59  ;;  %v2894_v57 = vpop.f32.mrb[12].mxu1  ;;  %v2069_v2 = vadd.f32 %v2891_v46, %v2068_v60 }
 0x182   : > { %v1863_v36 = vadd.f32 %v2896_v43, %v1862_v63  ;;  %v1884_v5 = vadd.f32 %v1877_v0, %v1876_v62  ;;  %v2870_v6 = vpop.f32.mrb[4].mxu0  ;;  %2065 = vst [vmem:[%s3554_s26 + $0x30] sm:$0xff] %v2894_v57  ;;  %v2044_v7 = vpop.f32.mrb[13].mxu1  ;;  %v2087_v31 = vmul.f32 %v2894_v57, %v2894_v57 }
 0x183   : > { %v2900_v8 = vadd.f32 %v2870_v6, %v2750_v37  ;;  %v1831_v9 = vpop.f32.mrb[5].mxu0  ;;  %2063 = vst [vmem:[%s3554_s26 + $0x20] sm:$0xff] %v2044_v7  ;;  %v2070_v10 = vadd.f32 %v2069_v2, %v2044_v7  ;;  %v2085_v12 = vmul.f32 %v2044_v7, %v2044_v7  ;;  %v2091_v13 = vadd.f32 %v2090_v1, %v2084_v3  ;;  %v2895_v11 = vpop.f32.mrb[14].mxu1 }
 0x184   : > { %v1885_v15 = vadd.f32 %v1884_v5, %v1878_v4  ;;  %v2901_v16 = vadd.f32 %v1831_v9, %v1080_v38  ;;  %v1864_v50 = vadd.f32 %v2898_v51, %v1863_v36  ;;  %v2871_v17 = vpop.f32.mrb[6].mxu0  ;;  %2066 = vst [vmem:[%s3554_s26 + $0x38] sm:$0xff] %v2895_v11  ;;  %v2047_v18 = vpop.f32.mrb[15].mxu1  ;;  %v2088_v38 = vmul.f32 %v2895_v11, %v2895_v11 }
 0x185   : > { %1860 = vst [vmem:[%s3560_s23 + $0x30] sm:$0xff] %v2900_v8  ;;  %v2092_v19 = vadd.f32 %v2091_v13, %v2085_v12  ;;  %v2902_v54 = vadd.f32 %v2871_v17, %v2751_v39  ;;  %v1834_v56 = vpop.f32.mrb[7].mxu0  ;;  %2064 = vst [vmem:[%s3554_s26 + $0x28] sm:$0xff] %v2047_v18  ;;  %v2071_v20 = vadd.f32 %v2070_v10, %v2047_v18 }
 0x186   : > { %1858 = vst [vmem:[%s3560_s23 + $0x20] sm:$0xff] %v2901_v16  ;;  %v1865_v21 = vadd.f32 %v2901_v16, %v1864_v50  ;;  %v1880_v22 = vmul.f32 %v2901_v16, %v2901_v16  ;;  %v1886_v23 = vadd.f32 %v1885_v15, %v1879_v14  ;;  %v2903_v24 = vadd.f32 %v1834_v56, %v3548_v40 }
 0x187   : > { %1861 = vst [vmem:[%s3560_s23 + $0x38] sm:$0xff] %v2902_v54  ;;  %v2072_v25 = vadd.f32 %v2894_v57, %v2071_v20  ;;  %v2086_v26 = vmul.f32 %v2047_v18, %v2047_v18  ;;  %v1882_v34 = vmul.f32 %v2900_v8, %v2900_v8  ;;  %v1883_v41 = vmul.f32 %v2902_v54, %v2902_v54 }
 0x188   : > { %v1887_v27 = vadd.f32 %v1886_v23, %v1880_v22  ;;  %1859 = vst [vmem:[%s3560_s23 + $0x28] sm:$0xff] %v2903_v24  ;;  %v1866_v28 = vadd.f32 %v2903_v24, %v1865_v21  ;;  %v1881_v29 = vmul.f32 %v2903_v24, %v2903_v24 }
 0x189   : > { %v2073_v32 = vadd.f32 %v2895_v11, %v2072_v25  ;;  %v2093_v33 = vadd.f32 %v2092_v19, %v2086_v26 }
 0x18a   : > { %v1867_v35 = vadd.f32 %v2900_v8, %v1866_v28  ;;  %v1888_v37 = vadd.f32 %v1887_v27, %v1881_v29 }
 0x18b   : > { %v2074_v39 = vrot.slane %v2073_v32, 4  ;;  %v2094_v30 = vadd.f32 %v2093_v33, %v2087_v31 }
 0x18c   : > { %v1868_v42 = vadd.f32 %v2902_v54, %v1867_v35  ;;  %v1889_v43 = vadd.f32 %v1888_v37, %v1882_v34 }
 0x18d   : > { %v2075_v40 = vadd.f32 %v2074_v39, %v2073_v32  ;;  %v2095_v44 = vadd.f32 %v2094_v30, %v2088_v38 }
 0x18e   : > { %v1869_v45 = vrot.slane %v1868_v42, 4  ;;  %v1890_v46 = vadd.f32 %v1889_v43, %v1883_v41 }
 0x18f   : > { %v2076_v47 = vrot.slane %v2075_v40, 2  ;;  %v2096_v48 = vrot.slane %v2095_v44, 4 }
 0x190   : > { %v1870_v49 = vadd.f32 %v1869_v45, %v1868_v42  ;;  %v1891_v51 = vrot.slane %v1890_v46, 4 }
 0x191   : > { %v2077_v52 = vadd.f32 %v2076_v47, %v2075_v40  ;;  %v2097_v53 = vadd.f32 %v2096_v48, %v2095_v44 }
 0x192   : > { %v1871_v55 = vrot.slane %v1870_v49, 2  ;;  %v1892_v58 = vadd.f32 %v1891_v51, %v1890_v46 }
 0x193   : > { %v2078_v59 = vrot.slane %v2077_v52, 1  ;;  %v2098_v60 = vrot.slane %v2097_v53, 2 }
 0x194   : > { %v1872_v61 = vadd.f32 %v1871_v55, %v1870_v49  ;;  %v1893_v62 = vrot.slane %v1892_v58, 2 }
 0x195   : > { %v2079_v63 = vadd.f32 %v2078_v59, %v2077_v52  ;;  %v2099_v0 = vadd.f32 %v2098_v60, %v2097_v53 }
 0x196   : > { %v1873_v3 = vrot.slane %v1872_v61, 1  ;;  %v1894_v1 = vadd.f32 %v1893_v62, %v1892_v58 }
 0x197   : > { %2080 = vst [vmem:[%s448_s25] sm:$0x1] %v2079_v63  ;;  %v2100_v57 = vrot.slane %v2099_v0, 1 }
 0x198   : > { %v1874_v2 = vadd.f32 %v1873_v3, %v1872_v61  ;;  %v1895_v4 = vrot.slane %v1894_v1, 1 }
 0x199   : > { %v2101_v36 = vadd.f32 %v2100_v57, %v2099_v0 }
 0x19a   : > { %1875 = vst [vmem:[%s437_s30] sm:$0x1] %v1874_v2  ;;  %v1896_v5 = vadd.f32 %v1895_v4, %v1894_v1 }
 0x19b   : > { %2102 = vst [vmem:[%s451_s14] sm:$0x1] %v2101_v36 }
 0x19c   : > { %1897 = vst [vmem:[%s440_s20] sm:$0x1] %v1896_v5 }
 0x19d PF: > { %s22_s17 = sadd.s32 1, %s3059_s17  }
 0x19e   : > { %p19_p4 = scmp.ge.s32.totalorder %s22_s17, 4  }
 0x1a0   :  { %21 = sbr.rel (!%p19_p4) target bundleno = 1 (0x1), region = 147 }

// kernel: basic_block_forward.3
= control target key start
LH: loop header
LB: loop body
LE: loop exit
PB: predicated region body
PF: predicated region fallthrough
CT: control target
= control target key end

     0   :  { %s3235_s24 = smov 0   ;;  %s3629_s0 = inlined_call_operand.vmem [shape: bf16[2,9,9,128], index: 0, kind: input, shape index: {}]   ;;  %s3630_s1 = inlined_call_operand.vmem [shape: bf16[2,9,9,128], index: 1, kind: input, shape index: {}]   ;;  %s3631_s2 = inlined_call_operand.vmem [shape: bf16[2,9,9,128], index: 2, kind: input, shape index: {}]   ;;  %s3632_s3 = inlined_call_operand.vmem [shape: bf16[2,9,9,128], index: 3, kind: input, shape index: {}]   ;;  %s3633_s4 = inlined_call_operand.vmem [shape: bf16[9,128,128], index: 4, kind: input, shape index: {}]   ;;  %s3634_s5 = inlined_call_operand.vmem [shape: f32[2,64,128], index: 5, kind: output, shape index: {0}]   ;;  %s3635_s6 = inlined_call_operand.vmem [shape: f32[2,1,128], index: 6, kind: output, shape index: {1}]   ;;  %s3636_s7 = inlined_call_operand.vmem [shape: f32[2,1,128], index: 7, kind: output, shape index: {2}]  }
   0x1 LB: > { %s2396_s25 = sadd.s32 4294967295, %s3193_s24   ;;  %p2400_p0 = scmp.ge.s32.totalorder %s3193_s24, 1  ;;  %s3193_s24 = sphi %s3235_s24, %s18_s24  }
   0x2   : > { %p272_p1 = scmp.lt.s32.totalorder %s3193_s24, 3 }
   0x4   : > { %p273_p2 = pnand %p2400_p0, %p272_p1 }
   0x5   : > { %v3091_v0 = vld [vmem:[%s3633_s4 + $0x40] sm:$0xff] (!%p273_p2)   ;;  %p325_p3 = scmp.lt.s32.totalorder (!%p273_p2), %s2396_s25, 1  ;;  %v3093_v2 = vld [vmem:[%s3633_s4 + $0x48] sm:$0xff] (!%p273_p2)   ;;  %v3095_v4 = vld [vmem:[%s3633_s4 + $0x50] sm:$0xff] (!%p273_p2)   ;;  %vm696_vm0 = vsmask.f32 (!%p273_p2), 3328 }
   0x6   : > { %276 = sbr.rel (%p273_p2) target bundleno = 413 (0x19d), region = 40  ;;  %v3092_v1 = vld [vmem:[%s3633_s4 + $0x100] sm:$0xff] (!%p273_p2)   ;;  %2786 = vmatprep.subr.bf16.mxu1 (!%p273_p2), %v3091_v0  ;;  %v3094_v3 = vld [vmem:[%s3633_s4 + $0x108] sm:$0xff] (!%p273_p2)   ;;  %v3096_v5 = vld [vmem:[%s3633_s4 + $0x110] sm:$0xff] (!%p273_p2)   ;;  %vm697_vm1 = vsmask.f32 (!%p273_p2), 7440 }
   0x7   : > { %2882 = vmatprep.subr.bf16.mxu0 (!%p273_p2), %v3092_v1  ;;  %2787 = vmatpush3.bf16.msra.mxu1 (!%p273_p2), %v3091_v0  ;;  %v3097_v6 = vld [vmem:[%s3633_s4 + $0x58] sm:$0xff] (!%p273_p2)   ;;  %v3099_v8 = vld [vmem:[%s3633_s4 + $0x60] sm:$0xff] (!%p273_p2)   ;;  %v3101_v10 = vld [vmem:[%s3633_s4 + $0x68] sm:$0xff] (!%p273_p2)  }
   0x8   : > { %2883 = vmatpush3.bf16.msra.mxu0 (!%p273_p2), %v3092_v1  ;;  %2788 = vmatprep.subr.bf16.mxu1 (!%p273_p2), %v3093_v2  ;;  %v3098_v7 = vld [vmem:[%s3633_s4 + $0x118] sm:$0xff] (!%p273_p2)   ;;  %v3100_v9 = vld [vmem:[%s3633_s4 + $0x120] sm:$0xff] (!%p273_p2)   ;;  %v3102_v12 = vld [vmem:[%s3633_s4 + $0x128] sm:$0xff] (!%p273_p2)  }
   0x9   : > { %2884 = vmatprep.subr.bf16.mxu0 (!%p273_p2), %v3094_v3  ;;  %v3103_v14 = vld [vmem:[%s3633_s4 + $0x70] sm:$0xff] (!%p273_p2)   ;;  %v3105_v16 = vld [vmem:[%s3633_s4 + $0x78] sm:$0xff] (!%p273_p2)   ;;  %v3108_v18 = vld [vmem:[%s3633_s4] sm:$0xff] (!%p273_p2)  }
   0xa   : > { %v3104_v15 = vld [vmem:[%s3633_s4 + $0x130] sm:$0xff] (!%p273_p2)   ;;  %v3106_v17 = vld [vmem:[%s3633_s4 + $0x138] sm:$0xff] (!%p273_p2)   ;;  %v3110_v19 = vld [vmem:[%s3633_s4 + $0x140] sm:$0xff] (!%p273_p2)  }
   0xb   : > { %2789 = vmatpush3.bf16.msra.mxu1 (!%p273_p2), %v3093_v2  ;;  %v3113_v22 = vld [vmem:[%s3633_s4 + $0x8] sm:$0xff] (!%p273_p2)   ;;  %v3115_v26 = vld [vmem:[%s3633_s4 + $0x10] sm:$0xff] (!%p273_p2)   ;;  %v3117_v28 = vld [vmem:[%s3633_s4 + $0x18] sm:$0xff] (!%p273_p2)  }
   0xc   : > { %2885 = vmatpush3.bf16.msra.mxu0 (!%p273_p2), %v3094_v3  ;;  %2790 = vmatprep.subr.bf16.mxu1 (!%p273_p2), %v3095_v4  ;;  %v3114_v23 = vld [vmem:[%s3633_s4 + $0x148] sm:$0xff] (!%p273_p2)   ;;  %v3116_v27 = vld [vmem:[%s3633_s4 + $0x150] sm:$0xff] (!%p273_p2)   ;;  %v3118_v31 = vld [vmem:[%s3633_s4 + $0x158] sm:$0xff] (!%p273_p2)  }
   0xd   : > { %s3640_s25 = smov (!%p325_p3, %s2396_s25), 1  ;;  %2886 = vmatprep.subr.bf16.mxu0 %v3096_v5  ;;  %v3119_v38 = vld [vmem:[%s3633_s4 + $0x20] sm:$0xff]   ;;  %v3121_v47 = vld [vmem:[%s3633_s4 + $0x28] sm:$0xff]   ;;  %vm3371_vm2 = vmor %vm696_vm0, %vm697_vm1 }
   0xe   : > { %s3270_s19 = smul.u32 72, %s3640_s25  ;;  %v3120_v43 = vld [vmem:[%s3633_s4 + $0x160] sm:$0xff]   ;;  %v3122_v50 = vld [vmem:[%s3633_s4 + $0x168] sm:$0xff]   ;;  %v3124_v2 = vld [vmem:[%s3633_s4 + $0x30] sm:$0xff]   ;;  %s2677_s30 = sshll.u32 %s3640_s25, 6 }
   0xf   : > { %2791 = vmatpush3.bf16.msra.mxu1 %v3095_v4  ;;  %s349_s11 = scalar_lea.vmem %s3634_s5, %s2677_s30  ;;  %s352_s14 = scalar_lea.vmem %s3635_s6, %s3640_s25 }
  0x10   : > { %2887 = vmatpush3.bf16.msra.mxu0 %v3096_v5  ;;  %2792 = vmatprep.subr.bf16.mxu1 %v3097_v6  ;;  %s3282_s28 = scalar_lea.vmem %s3630_s1, %s3270_s19  ;;  %s3291_s10 = scalar_lea.vmem %s3632_s3, %s3270_s19 }
  0x11   : > { %2888 = vmatprep.subr.bf16.mxu0 %v3098_v7  ;;  %v3107_v11 = vld [vmem:[%s3282_s28] ss:$8 sps:$4 sm:$0xff]   ;;  %v3111_v20 = vld [vmem:[%s3282_s28 + $0x10] ss:$8 sps:$4 sm:$0xff]   ;;  %s3336_s17 = scalar_lea.vmem %s3629_s0, %s3270_s19  ;;  %s3346_s23 = scalar_lea.vmem %s3631_s2, %s3270_s19 }
  0x12   : > { %2802 = vmatprep.mubr.bf16.mxu1 %v3107_v11  ;;  %v3109_v13 = vld [vmem:[%s3291_s10] ss:$8 sps:$4 sm:$0xff]   ;;  %v3112_v21 = vld [vmem:[%s3291_s10 + $0x10] ss:$8 sps:$4 sm:$0xff]   ;;  %v1306_v34 = vld [vmem:[%s3346_s23 + $0x4] sm:$0x1]  ;;  %s355_s18 = scalar_lea.vmem %s3636_s7, %s3640_s25 }
  0x13   : > { %2793 = vmatpush3.bf16.msra.mxu1 %v3097_v6  ;;  %2898 = vmatprep.mubr.bf16.mxu0 %v3109_v13  ;;  %v3123_v24 = vld [vmem:[%s3282_s28 + $0x20] ss:$8 sps:$4 sm:$0xff]   ;;  %v3127_v29 = vld [vmem:[%s3282_s28 + $0x30] ss:$8 sps:$4 sm:$0xff]   ;;  %v1308_v39 = vld [vmem:[%s3346_s23 + $0xc] sm:$0x1] }
  0x14   : > { %2889 = vmatpush3.bf16.msra.mxu0 %v3098_v7  ;;  %2794 = vmatprep.subr.bf16.mxu1 %v3099_v8  ;;  %v3125_v25 = vld [vmem:[%s3291_s10 + $0x20] ss:$8 sps:$4 sm:$0xff]   ;;  %v3128_v30 = vld [vmem:[%s3291_s10 + $0x30] ss:$8 sps:$4 sm:$0xff]   ;;  %v1331_v40 = vshll.u32 %v1306_v34, 16  ;;  %v1345_v46 = vshll.u32 %v1308_v39, 16 }
  0x15   : > { %2890 = vmatprep.subr.bf16.mxu0 %v3100_v9  ;;  %v3131_v32 = vld [vmem:[%s3336_s17] ss:$8 sps:$4 sm:$0xff]   ;;  %v1309_v56 = vld [vmem:[%s3346_s23 + $0x10] sm:$0xf]  ;;  %v1310_v57 = vld [vmem:[%s3346_s23 + $0x14] sm:$0x1] }
  0x16   : > { %v1305_v33 = vld [vmem:[%s3346_s23] sm:$0xf]  ;;  %v1307_v35 = vld [vmem:[%s3346_s23 + $0x8] sm:$0xf]  ;;  %v1333_v52 = vrot.slane %v1331_v40, 5  ;;  %v1347_v55 = vrot.slane %v1345_v46, 5 }
  0x17   : > { %2795 = vmatpush3.bf16.msra.mxu1 %v3099_v8  ;;  %v1322_v36 = vshrl.u32 %v1305_v33, 16  ;;  %v1325_v37 = vshll.u32 %v1305_v33, 16  ;;  %v1336_v41 = vshrl.u32 %v1307_v35, 16  ;;  %v1339_v42 = vshll.u32 %v1307_v35, 16  ;;  %v1311_v59 = vld [vmem:[%s3346_s23 + $0x18] sm:$0xf] }
  0x18   : > { %2891 = vmatpush3.bf16.msra.mxu0 %v3100_v9  ;;  %2796 = vmatprep.subr.bf16.mxu1 %v3101_v10  ;;  %v1312_v60 = vld [vmem:[%s3346_s23 + $0x1c] sm:$0x1]  ;;  %v1350_v61 = vshrl.u32 %v1309_v56, 16  ;;  %v1353_v63 = vshll.u32 %v1309_v56, 16  ;;  %v1359_v0 = vshll.u32 %v1310_v57, 16  ;;  %v1364_v1 = vshrl.u32 %v1311_v59, 16 }
  0x19   : > { %2892 = vmatprep.subr.bf16.mxu0 %v3102_v12  ;;  %v1324_v44 = vrot.slane %v1322_v36, 4  ;;  %v1327_v45 = vrot.slane %v1325_v37, 5  ;;  %v1338_v48 = vrot.slane %v1336_v41, 4  ;;  %v1341_v49 = vrot.slane %v1339_v42, 5  ;;  %v3126_v6 = vld [vmem:[%s3633_s4 + $0x170] sm:$0xff]  }
  0x1a   : > { %v1352_v4 = vrot.slane %v1350_v61, 4  ;;  %v1367_v5 = vshll.u32 %v1311_v59, 16  ;;  %v1355_v8 = vrot.slane %v1353_v63, 5  ;;  %v1366_v9 = vrot.slane %v1364_v1, 4  ;;  %v3145_v37 = vld [vmem:[%s3336_s17 + $0x20] ss:$8 sps:$4 sm:$0xff]  }
  0x1b   : > { %2797 = vmatpush3.bf16.msra.mxu1 %v3101_v10  ;;  %v1328_v51 = vor.u32 %v1327_v45, %v1324_v44  ;;  %v1342_v54 = vor.u32 %v1341_v49, %v1338_v48  ;;  %v1373_v10 = vshll.u32 %v1312_v60, 16  ;;  %v3148_v48 = vld [vmem:[%s3336_s17 + $0x30] ss:$8 sps:$4 sm:$0xff]  }
  0x1c   : > { %2893 = vmatpush3.bf16.msra.mxu0 %v3102_v12  ;;  %2798 = vmatprep.subr.bf16.mxu1 %v3103_v14  ;;  %v1361_v12 = vrot.slane %v1359_v0, 5  ;;  %v1369_v13 = vrot.slane %v1367_v5, 5  ;;  %v1317_v49 = vld [vmem:[%s3346_s23 + $0x30] sm:$0xf]  ;;  %v3139_v59 = vld [vmem:[%s3633_s4 + $0x98] sm:$0xff]  }
  0x1d   : > { %2894 = vmatprep.subr.bf16.mxu0 %v3104_v15  ;;  %v1329_v58 = vrot.slane %v1328_v51, 4  ;;  %v1343_v62 = vrot.slane %v1342_v54, 4  ;;  %v1319_v51 = vld [vmem:[%s3346_s23 + $0x38] sm:$0xf]  ;;  %v1406_v56 = vshrl.u32 %v1317_v49, 16  ;;  %v1409_v57 = vshll.u32 %v1317_v49, 16 }
  0x1e   : > { %v1420_v61 = vshrl.u32 %v1319_v51, 16 }
  0x1f   : > { %2799 = vmatpush3.bf16.msra.mxu1 %v3103_v14  ;;  %v1334_v3 = vsel %vm3371_vm2, %v1329_v58, %v1333_v52  ;;  %v1348_v7 = vsel %vm3371_vm2, %v1343_v62, %v1347_v55  ;;  %v3129_v14 = vld [vmem:[%s3633_s4 + $0x38] sm:$0xff]   ;;  %v3138_v52 = vld [vmem:[%s3633_s4 + $0x190] sm:$0xff]   ;;  %v1423_v62 = vshll.u32 %v1319_v51, 16  ;;  %v1408_v1 = vrot.slane %v1406_v56, 4 }
  0x20   : > { %2895 = vmatpush3.bf16.msra.mxu0 %v3104_v15  ;;  %2800 = vmatprep.subr.bf16.mxu1 %v3105_v16  ;;  %v2547_v11 = vcombine.low %v1334_v3, %v1348_v7  ;;  %v1356_v15 = vor.u32 %v1355_v8, %v1352_v4  ;;  %v1320_v55 = vld [vmem:[%s3346_s23 + $0x3c] sm:$0x1] }
  0x21   : > { %2896 = vmatprep.subr.bf16.mxu0 %v3106_v17  ;;  %v1429_v63 = vshll.u32 %v1320_v55, 16  ;;  %v3140_v4 = vld [vmem:[%s3633_s4 + $0x198] sm:$0xff]   ;;  %v1425_v7 = vrot.slane %v1423_v62, 5 }
  0x23   : > { %2801 = vmatpush3.bf16.msra.mxu1 %v3105_v16  ;;  %v1370_v16 = vor.u32 %v1369_v13, %v1366_v9  ;;  %v1431_v8 = vrot.slane %v1429_v63, 5  ;;  %v3141_v13 = vld [vmem:[%s3633_s4 + $0xa0] sm:$0xff]  }
  0x24   : > { %2897 = vmatpush3.bf16.msra.mxu0 %v3106_v17  ;;  %2810 = vmatprep.subr.bf16.mxu1 %v3108_v18  ;;  %v1357_v17 = vrot.slane %v1356_v15, 4 }
  0x25   : > { %2906 = vmatprep.subr.bf16.mxu0 %v3110_v19 }
  0x26   : > { %2803 = vmatmul.mubr.bf16.vlgmr.msra.gmra.mrb[0].mxu1 %v3111_v20  ;;  %v1371_v20 = vrot.slane %v1370_v16, 4  ;;  %v682_v16 = vld [vmem:[%s3336_s17 + $0x8] sm:$0xf] }
  0x27   : > { %2811 = vmatpush3.bf16.msra.mxu1 %v3108_v18  ;;  %2899 = vmatmul.mubr.bf16.vlgmr.msra.gmra.mrb[0].mxu0 %v3112_v21  ;;  %v1375_v18 = vrot.slane %v1373_v10, 5  ;;  %v3132_v21 = vld [vmem:[%s3633_s4 + $0x80] sm:$0xff]  }
  0x28   : > { %2907 = vmatpush3.bf16.msra.mxu0 %v3110_v19  ;;  %2812 = vmatprep.subr.bf16.mxu1 %v3113_v22  ;;  %v3130_v19 = vld [vmem:[%s3633_s4 + $0x178] sm:$0xff]  }
  0x29   : > { %2908 = vmatprep.subr.bf16.mxu0 %v3114_v23  ;;  %2806 = vmatprep.mubr.bf16.mxu1 %v3123_v24  ;;  %v3133_v24 = vld [vmem:[%s3633_s4 + $0x180] sm:$0xff]  }
  0x2a   : > { %2902 = vmatprep.mubr.bf16.mxu0 %v3125_v25  ;;  %v3134_v25 = vld [vmem:[%s3336_s17 + $0x10] ss:$8 sps:$4 sm:$0xff]  }
  0x2b   : > { %2813 = vmatpush3.bf16.msra.mxu1 %v3113_v22  ;;  %v1362_v22 = vsel %vm3371_vm2, %v1357_v17, %v1361_v12  ;;  %v681_v12 = vld [vmem:[%s3336_s17 + $0x4] sm:$0x1]  ;;  %v683_v17 = vld [vmem:[%s3336_s17 + $0xc] sm:$0x1] }
  0x2c   : > { %2909 = vmatpush3.bf16.msra.mxu0 %v3114_v23  ;;  %2814 = vmatprep.subr.bf16.mxu1 %v3115_v26  ;;  %v1376_v23 = vsel %vm3371_vm2, %v1371_v20, %v1375_v18 }
  0x2d   : > { %2910 = vmatprep.subr.bf16.mxu0 %v3116_v27 }
  0x2e   : > { %2807 = vmatmul.mubr.bf16.gmra.mrb[4].mxu1 %v3127_v29  ;;  %v3136_v29 = vld [vmem:[%s3633_s4 + $0x188] sm:$0xff]  }
  0x2f   : > { %2815 = vmatpush3.bf16.msra.mxu1 %v3115_v26  ;;  %2903 = vmatmul.mubr.bf16.gmra.mrb[4].mxu0 %v3128_v30  ;;  %v3135_v26 = vld [vmem:[%s3633_s4 + $0x88] sm:$0xff]   ;;  %v1314_v30 = vld [vmem:[%s3346_s23 + $0x24] sm:$0x1] }
  0x30   : > { %2911 = vmatpush3.bf16.msra.mxu0 %v3116_v27  ;;  %2816 = vmatprep.subr.bf16.mxu1 %v3117_v28  ;;  %v1313_v27 = vld [vmem:[%s3346_s23 + $0x20] sm:$0xf]  ;;  %v1387_v35 = vshll.u32 %v1314_v30, 16 }
  0x31   : > { %2912 = vmatprep.subr.bf16.mxu0 %v3118_v31  ;;  %2826 = vmatprep.mubr.bf16.mxu1 %v3131_v32  ;;  %v1316_v32 = vld [vmem:[%s3346_s23 + $0x2c] sm:$0x1]  ;;  %v1378_v33 = vshrl.u32 %v1313_v27, 16  ;;  %v1381_v34 = vshll.u32 %v1313_v27, 16  ;;  %v723_v27 = vshll.u32 %v683_v17, 16 }
  0x32   : > { %2922 = vmatprep.mubr.bf16.mxu0 %v2547_v11  ;;  %v1401_v39 = vshll.u32 %v1316_v32, 16  ;;  %v1389_v44 = vrot.slane %v1387_v35, 5  ;;  %v680_v11 = vld [vmem:[%s3336_s17] sm:$0xf]  ;;  %v3143_v32 = vld [vmem:[%s3633_s4 + $0xa8] sm:$0xff]  }
  0x33   : > { %2817 = vmatpush3.bf16.msra.mxu1 %v3117_v28  ;;  %v2548_v28 = vcombine.low %v1362_v22, %v1376_v23  ;;  %v1380_v40 = vrot.slane %v1378_v33, 4  ;;  %v1383_v41 = vrot.slane %v1381_v34, 5  ;;  %v700_v18 = vshrl.u32 %v680_v11, 16  ;;  %v691_v17 = vld [vmem:[%s3336_s17 + $0x2c] sm:$0x1] }
  0x34   : > { %2913 = vmatpush3.bf16.msra.mxu0 %v3118_v31  ;;  %2818 = vmatprep.subr.bf16.mxu1 %v3119_v38  ;;  %v1315_v31 = vld [vmem:[%s3346_s23 + $0x28] sm:$0xf]  ;;  %v1403_v46 = vrot.slane %v1401_v39, 5  ;;  %v714_v22 = vshrl.u32 %v682_v16, 16  ;;  %v717_v23 = vshll.u32 %v682_v16, 16 }
  0x35   : > { %2914 = vmatprep.subr.bf16.mxu0 %v3120_v43  ;;  %v1392_v36 = vshrl.u32 %v1315_v31, 16  ;;  %v690_v16 = vld [vmem:[%s3336_s17 + $0x28] sm:$0xf] }
  0x36   : > { %v716_v30 = vrot.slane %v714_v22, 4  ;;  %v770_v22 = vshrl.u32 %v690_v16, 16 }
  0x37   : > { %2819 = vmatpush3.bf16.msra.mxu1 %v3119_v38  ;;  %v1395_v38 = vshll.u32 %v1315_v31, 16  ;;  %v1394_v42 = vrot.slane %v1392_v36, 4  ;;  %v719_v31 = vrot.slane %v717_v23, 5  ;;  %v725_v36 = vrot.slane %v723_v27, 5 }
  0x38   : > { %2915 = vmatpush3.bf16.msra.mxu0 %v3120_v43  ;;  %2820 = vmatprep.subr.bf16.mxu1 %v3121_v47  ;;  %v3137_v43 = vld [vmem:[%s3633_s4 + $0x90] sm:$0xff]   ;;  %v773_v23 = vshll.u32 %v690_v16, 16  ;;  %v2632_v16 = vld [vmem:[%s3336_s17 + $0xc] sm:$0x1] }
  0x39   : > { %2916 = vmatprep.subr.bf16.mxu0 %v3122_v50  ;;  %v1397_v45 = vrot.slane %v1395_v38, 5  ;;  %v3144_v38 = vld [vmem:[%s3633_s4 + $0x1a8] sm:$0xff]  }
  0x3b   : > { %2821 = vmatpush3.bf16.msra.mxu1 %v3121_v47  ;;  %v1384_v47 = vor.u32 %v1383_v41, %v1380_v40  ;;  %v1398_v54 = vor.u32 %v1397_v45, %v1394_v42  ;;  %v720_v40 = vor.u32 %v719_v31, %v716_v30  ;;  %v684_v41 = vld [vmem:[%s3336_s17 + $0x10] sm:$0xf]  ;;  %v775_v31 = vrot.slane %v773_v23, 5 }
  0x3c   : > { %2917 = vmatpush3.bf16.msra.mxu0 %v3122_v50  ;;  %2822 = vmatprep.subr.bf16.mxu1 %v3124_v2  ;;  %v1318_v50 = vld [vmem:[%s3346_s23 + $0x34] sm:$0x1]  ;;  %v728_v45 = vshrl.u32 %v684_v41, 16  ;;  %v692_v30 = vld [vmem:[%s3336_s17 + $0x30] sm:$0xf] }
  0x3d   : > { %2918 = vmatprep.subr.bf16.mxu0 %v3126_v6  ;;  %v1415_v58 = vshll.u32 %v1318_v50, 16  ;;  %v1385_v60 = vrot.slane %v1384_v47, 4  ;;  %v1399_v0 = vrot.slane %v1398_v54, 4  ;;  %v687_v47 = vld [vmem:[%s3336_s17 + $0x1c] sm:$0x1] }
  0x3f   : > { %2823 = vmatpush3.bf16.msra.mxu1 %v3124_v2  ;;  %v1411_v2 = vrot.slane %v1409_v57, 5  ;;  %v1417_v3 = vrot.slane %v1415_v58, 5  ;;  %v1390_v5 = vsel %vm3371_vm2, %v1385_v60, %v1389_v44  ;;  %v1404_v9 = vsel %vm3371_vm2, %v1399_v0, %v1403_v46  ;;  %v686_v44 = vld [vmem:[%s3336_s17 + $0x18] sm:$0xf]  ;;  %v3147_v60 = vld [vmem:[%s3633_s4 + $0x1b0] sm:$0xff]  }
  0x40   : > { %2919 = vmatpush3.bf16.msra.mxu0 %v3126_v6  ;;  %2824 = vmatprep.subr.bf16.mxu1 %v3129_v14  ;;  %v1422_v6 = vrot.slane %v1420_v61, 4  ;;  %v721_v46 = vrot.slane %v720_v40, 4  ;;  %v742_v50 = vshrl.u32 %v686_v44, 16  ;;  %v745_v54 = vshll.u32 %v686_v44, 16 }
  0x41   : > { %2920 = vmatprep.subr.bf16.mxu0 %v3130_v19  ;;  %v1412_v10 = vor.u32 %v1411_v2, %v1408_v1  ;;  %v751_v58 = vshll.u32 %v687_v47, 16 }
  0x42   : > { %v1426_v15 = vor.u32 %v1425_v7, %v1422_v6  ;;  %v726_v55 = vsel %vm3371_vm2, %v721_v46, %v725_v36  ;;  %v744_v57 = vrot.slane %v742_v50, 4  ;;  %v747_v63 = vrot.slane %v745_v54, 5  ;;  %v3150_v6 = vld [vmem:[%s3633_s4 + $0x1b8] sm:$0xff]   ;;  %v3151_v7 = vld [vmem:[%s3633_s4 + $0xc0] sm:$0xff]  }
  0x43   : > { %2825 = vmatpush3.bf16.msra.mxu1 %v3129_v14  ;;  %v2549_v14 = vcombine.low %v1390_v5, %v1404_v9  ;;  %v1413_v20 = vrot.slane %v1412_v10, 4  ;;  %v3153_v10 = vld [vmem:[%s3633_s4 + $0x1c0] sm:$0xff]   ;;  %v3159_v50 = vld [vmem:[%s3633_s4 + $0xd8] sm:$0xff]  }
  0x44   : > { %2921 = vmatpush3.bf16.msra.mxu0 %v3130_v19  ;;  %2834 = vmatprep.subr.bf16.mxu1 %v3132_v21  ;;  %v703_v19 = vshll.u32 %v680_v11, 16  ;;  %v748_v1 = vor.u32 %v747_v63, %v744_v57  ;;  %v3154_v11 = vld [vmem:[%s3336_s17 + $0x18] ss:$8 sps:$4 sm:$0xff]  }
  0x45   : > { %2930 = vmatprep.subr.bf16.mxu0 %v3133_v24 }
  0x46   : > { %2827 = vmatmul.mubr.bf16.vlgmr.msra.gmra.mrb[0].mxu1 %v3134_v25  ;;  %v702_v25 = vrot.slane %v700_v18, 4  ;;  %v749_v5 = vrot.slane %v748_v1, 4  ;;  %v3156_v18 = vld [vmem:[%s3633_s4 + $0x1c8] sm:$0xff]   ;;  %v3161_v1 = vld [vmem:[%s3633_s4 + $0xe0] sm:$0xff]  }
  0x47   : > { %2835 = vmatpush3.bf16.msra.mxu1 %v3132_v21  ;;  %2923 = vmatmul.mubr.bf16.vlgmr.msra.gmra.mrb[0].mxu0 %v2548_v28  ;;  %v709_v21 = vshll.u32 %v681_v12, 16  ;;  %v3142_v28 = vld [vmem:[%s3633_s4 + $0x1a0] sm:$0xff]  }
  0x48   : > { %2931 = vmatpush3.bf16.msra.mxu0 %v3133_v24  ;;  %2836 = vmatprep.subr.bf16.mxu1 %v3135_v26  ;;  %v1427_v24 = vrot.slane %v1426_v15, 4  ;;  %v688_v12 = vld [vmem:[%s3336_s17 + $0x20] sm:$0xf]  ;;  %v689_v15 = vld [vmem:[%s3336_s17 + $0x24] sm:$0x1] }
  0x49   : > { %2932 = vmatprep.subr.bf16.mxu0 %v3136_v29  ;;  %2830 = vmatprep.mubr.bf16.mxu1 %v3145_v37  ;;  %v711_v35 = vrot.slane %v709_v21, 5  ;;  %v3152_v37 = vld [vmem:[%s3336_s17 + $0x8] ss:$8 sps:$4 sm:$0xff]   ;;  %v765_v21 = vshll.u32 %v689_v15, 16 }
  0x4a   : > { %2926 = vmatprep.mubr.bf16.mxu0 %v2549_v14  ;;  %v1432_v33 = vsel %vm3371_vm2, %v1427_v24, %v1431_v8  ;;  %v3155_v14 = vld [vmem:[%s3633_s4 + $0xc8] sm:$0xff]   ;;  %v779_v24 = vshll.u32 %v691_v17, 16  ;;  %v2633_v17 = vld [vmem:[%s3336_s17 + $0x10] sm:$0xf] }
  0x4b   : > { %2837 = vmatpush3.bf16.msra.mxu1 %v3135_v26  ;;  %v705_v26 = vrot.slane %v703_v19, 5  ;;  %v756_v19 = vshrl.u32 %v688_v12, 16  ;;  %v2631_v15 = vld [vmem:[%s3336_s17 + $0x8] sm:$0xf]  ;;  %v1963_v23 = vshll.u32 %v2633_v17, 16 }
  0x4c   : > { %2933 = vmatpush3.bf16.msra.mxu0 %v3136_v29  ;;  %2838 = vmatprep.subr.bf16.mxu1 %v3137_v43  ;;  %v1418_v29 = vsel %vm3371_vm2, %v1413_v20, %v1417_v3  ;;  %v753_v3 = vrot.slane %v751_v58, 5  ;;  %v759_v20 = vshll.u32 %v688_v12, 16  ;;  %v3167_v58 = vld [vmem:[%s3336_s17 + $0x38] ss:$8 sps:$4 sm:$0xff]  }
  0x4d   : > { %2934 = vmatprep.subr.bf16.mxu0 %v3138_v52  ;;  %v706_v34 = vor.u32 %v705_v26, %v702_v25  ;;  %v2550_v39 = vcombine.low %v1418_v29, %v1432_v33  ;;  %v3165_v25 = vld [vmem:[%s3336_s17 + $0x28] ss:$8 sps:$4 sm:$0xff]   ;;  %v758_v26 = vrot.slane %v756_v19, 4  ;;  %v772_v29 = vrot.slane %v770_v22, 4  ;;  %v693_v33 = vld [vmem:[%s3336_s17 + $0x34] sm:$0x1] }
  0x4e   : > { %2831 = vmatmul.mubr.bf16.gmra.mrb[4].mxu1 %v3148_v48  ;;  %v731_v48 = vshll.u32 %v684_v41, 16  ;;  %v754_v9 = vsel %vm3371_vm2, %v749_v5, %v753_v3  ;;  %v761_v27 = vrot.slane %v759_v20, 5  ;;  %v793_v40 = vshll.u32 %v693_v33, 16  ;;  %v3158_v41 = vld [vmem:[%s3633_s4 + $0x1d0] sm:$0xff]   ;;  %v3162_v5 = vld [vmem:[%s3633_s4 + $0x1e0] sm:$0xff]   ;;  %v3169_v12 = vld [vmem:[%s3633_s4 + $0xf8] sm:$0xff]  }
  0x4f   : > { %2839 = vmatpush3.bf16.msra.mxu1 %v3137_v43  ;;  %v707_v42 = vrot.slane %v706_v34, 4  ;;  %v685_v43 = vld [vmem:[%s3336_s17 + $0x14] sm:$0x1]  ;;  %2927 = vmatmul.mubr.bf16.gmra.mrb[4].mxu0 %v2550_v39  ;;  %v694_v34 = vld [vmem:[%s3336_s17 + $0x38] sm:$0xf]  ;;  %v787_v39 = vshll.u32 %v692_v30, 16 }
  0x50   : > { %2935 = vmatpush3.bf16.msra.mxu0 %v3138_v52  ;;  %2840 = vmatprep.subr.bf16.mxu1 %v3139_v59  ;;  %v737_v49 = vshll.u32 %v685_v43, 16  ;;  %v730_v52 = vrot.slane %v728_v45, 4  ;;  %v733_v56 = vrot.slane %v731_v48, 5  ;;  %v762_v36 = vor.u32 %v761_v27, %v758_v26  ;;  %v2642_v33 = vld [vmem:[%s3336_s17 + $0x34] sm:$0x1] }
  0x51   : > { %2936 = vmatprep.subr.bf16.mxu0 %v3140_v4  ;;  %v712_v51 = vsel %vm3371_vm2, %v707_v42, %v711_v35  ;;  %2946 = vmatprep.mubr.bf16.mxu0 %v3152_v37  ;;  %v3157_v35 = vld [vmem:[%s3633_s4 + $0xd0] sm:$0xff]   ;;  %v695_v37 = vld [vmem:[%s3336_s17 + $0x3c] sm:$0x1]  ;;  %v776_v42 = vor.u32 %v775_v31, %v772_v29  ;;  %v798_v43 = vshrl.u32 %v694_v34, 16  ;;  %v801_v44 = vshll.u32 %v694_v34, 16 }
  0x52   : > { %v2463_v61 = vcombine.low %v712_v51, %v726_v55  ;;  %v739_v62 = vrot.slane %v737_v49, 5  ;;  %v734_v0 = vor.u32 %v733_v56, %v730_v52  ;;  %v807_v45 = vshll.u32 %v695_v37, 16  ;;  %v2641_v29 = vld [vmem:[%s3336_s17 + $0x30] sm:$0xf]  ;;  %v3174_v34 = vld [vmem:[%s3282_s28 + $0x18] ss:$8 sps:$4 sm:$0xff]  }
  0x53   : > { %2841 = vmatpush3.bf16.msra.mxu1 %v3139_v59  ;;  %v3146_v59 = vld [vmem:[%s3633_s4 + $0xb0] sm:$0xff]   ;;  %v763_v46 = vrot.slane %v762_v36, 4  ;;  %v789_v48 = vrot.slane %v787_v39, 5  ;;  %v795_v49 = vrot.slane %v793_v40, 5  ;;  %v777_v51 = vrot.slane %v776_v42, 4  ;;  %v3176_v39 = vld [vmem:[%s3633_s4 + $0x208] sm:$0xff]  }
  0x54   : > { %2937 = vmatpush3.bf16.msra.mxu0 %v3140_v4  ;;  %2842 = vmatprep.subr.bf16.mxu1 %v3141_v13  ;;  %v735_v2 = vrot.slane %v734_v0, 4  ;;  %v3149_v4 = vld [vmem:[%s3633_s4 + $0xb8] sm:$0xff]   ;;  %v800_v52 = vrot.slane %v798_v43, 4  ;;  %v803_v54 = vrot.slane %v801_v44, 5  ;;  %v809_v55 = vrot.slane %v807_v45, 5 }
  0x55   : > { %2938 = vmatprep.subr.bf16.mxu0 %v3142_v28  ;;  %2850 = vmatprep.mubr.bf16.mxu1 %v2463_v61  ;;  %v3160_v61 = vld [vmem:[%s3633_s4 + $0x1d8] sm:$0xff]   ;;  %v1946_v19 = vshrl.u32 %v2631_v15, 16  ;;  %v1949_v20 = vshll.u32 %v2631_v15, 16  ;;  %v1960_v22 = vshrl.u32 %v2633_v17, 16  ;;  %v2019_v42 = vshll.u32 %v2641_v29, 16  ;;  %v3183_v15 = vld [vmem:[%s3633_s4 + $0x220] sm:$0xff]  }
  0x56   : > { %v740_v8 = vsel %vm3371_vm2, %v735_v2, %v739_v62  ;;  %v2025_v43 = vshll.u32 %v2642_v33, 16  ;;  %v3177_v44 = vld [vmem:[%s3346_s23 + $0x20] ss:$8 sps:$4 sm:$0xff]  }
  0x57   : > { %2843 = vmatpush3.bf16.msra.mxu1 %v3141_v13  ;;  %v2464_v13 = vcombine.low %v740_v8, %v754_v9  ;;  %v3163_v8 = vld [vmem:[%s3633_s4 + $0xe8] sm:$0xff]   ;;  %v1948_v26 = vrot.slane %v1946_v19, 4  ;;  %v1951_v27 = vrot.slane %v1949_v20, 5  ;;  %v1962_v31 = vrot.slane %v1960_v22, 4 }
  0x58   : > { %2939 = vmatpush3.bf16.msra.mxu0 %v3142_v28  ;;  %2844 = vmatprep.subr.bf16.mxu1 %v3143_v32  ;;  %v767_v28 = vrot.slane %v765_v21, 5  ;;  %v3164_v9 = vld [vmem:[%s3633_s4 + $0x1e8] sm:$0xff]   ;;  %v1955_v21 = vshll.u32 %v2632_v16, 16 }
  0x59   : > { %2940 = vmatprep.subr.bf16.mxu0 %v3144_v38  ;;  %v3184_v20 = vld [vmem:[%s3633_s4 + $0x228] sm:$0xff]  }
  0x5a   : > { %v768_v56 = vsel %vm3371_vm2, %v763_v46, %v767_v28  ;;  %v2640_v28 = vld [vmem:[%s3336_s17 + $0x2c] sm:$0x1]  ;;  %v1957_v45 = vrot.slane %v1955_v21, 5  ;;  %v2644_v21 = vld [vmem:[%s3336_s17 + $0x3c] sm:$0x1] }
  0x5b   : > { %2845 = vmatpush3.bf16.msra.mxu1 %v3143_v32  ;;  %v781_v32 = vrot.slane %v779_v24, 5 }
  0x5c   : > { %2941 = vmatpush3.bf16.msra.mxu0 %v3144_v38  ;;  %2846 = vmatprep.subr.bf16.mxu1 %v3146_v59  ;;  %v784_v38 = vshrl.u32 %v692_v30, 16  ;;  %v3173_v30 = vld [vmem:[%s3346_s23 + $0x10] ss:$8 sps:$4 sm:$0xff]  }
  0x5d   : > { %2942 = vmatprep.subr.bf16.mxu0 %v3147_v60 }
  0x5e   : > { %v786_v47 = vrot.slane %v784_v38, 4  ;;  %v2011_v38 = vshll.u32 %v2640_v28, 16 }
  0x5f   : > { %2847 = vmatpush3.bf16.msra.mxu1 %v3146_v59  ;;  %v782_v59 = vsel %vm3371_vm2, %v777_v51, %v781_v32  ;;  %v1965_v32 = vrot.slane %v1963_v23, 5 }
  0x60   : > { %2943 = vmatpush3.bf16.msra.mxu0 %v3147_v60  ;;  %2848 = vmatprep.subr.bf16.mxu1 %v3149_v4  ;;  %v790_v57 = vor.u32 %v789_v48, %v786_v47  ;;  %v804_v60 = vor.u32 %v803_v54, %v800_v52  ;;  %v2465_v62 = vcombine.low %v768_v56, %v782_v59  ;;  %v2021_v54 = vrot.slane %v2019_v42, 5 }
  0x61   : > { %2944 = vmatprep.subr.bf16.mxu0 %v3150_v6  ;;  %v1966_v40 = vor.u32 %v1965_v32, %v1962_v31  ;;  %v2013_v56 = vrot.slane %v2011_v38, 5  ;;  %v2027_v59 = vrot.slane %v2025_v43, 5  ;;  %v2636_v31 = vld [vmem:[%s3336_s17 + $0x1c] sm:$0x1]  ;;  %v2638_v32 = vld [vmem:[%s3336_s17 + $0x24] sm:$0x1] }
  0x62   : > { %v791_v63 = vrot.slane %v790_v57, 4  ;;  %v805_v0 = vrot.slane %v804_v60, 4  ;;  %v3181_v57 = vld [vmem:[%s3633_s4 + $0x210] sm:$0xff]  }
  0x63   : > { %2849 = vmatpush3.bf16.msra.mxu1 %v3149_v4  ;;  %v3172_v4 = vld [vmem:[%s3282_s28 + $0x8] ss:$8 sps:$4 sm:$0xff]   ;;  %v1967_v51 = vrot.slane %v1966_v40, 4 }
  0x64   : > { %2945 = vmatpush3.bf16.msra.mxu0 %v3150_v6  ;;  %2858 = vmatprep.subr.bf16.mxu1 %v3151_v7  ;;  %v796_v2 = vsel %vm3371_vm2, %v791_v63, %v795_v49  ;;  %v810_v3 = vsel %vm3371_vm2, %v805_v0, %v809_v55  ;;  %v3178_v49 = vld [vmem:[%s3282_s28 + $0x28] ss:$8 sps:$4 sm:$0xff]  }
  0x65   : > { %2954 = vmatprep.subr.bf16.mxu0 %v3153_v10  ;;  %v2466_v6 = vcombine.low %v796_v2, %v810_v3  ;;  %v3182_v3 = vld [vmem:[%s3633_s4 + $0x218] sm:$0xff]  }
  0x66   : > { %2851 = vmatmul.mubr.bf16.vlgmr.msra.gmra.mrb[0].mxu1 %v2464_v13  ;;  %v3170_v13 = vld [vmem:[%s3633_s4 + $0x1f8] sm:$0xff]  }
  0x67   : > { %2859 = vmatpush3.bf16.msra.mxu1 %v3151_v7  ;;  %2947 = vmatmul.mubr.bf16.vlgmr.msra.gmra.mrb[0].mxu0 %v3154_v11  ;;  %v3171_v7 = vld [vmem:[%s3346_s23] ss:$8 sps:$4 sm:$0xff]   ;;  %v3168_v11 = vld [vmem:[%s3633_s4 + $0x1f0] sm:$0xff]  }
  0x68   : > { %2955 = vmatpush3.bf16.msra.mxu0 %v3153_v10  ;;  %2860 = vmatprep.subr.bf16.mxu1 %v3155_v14  ;;  %v3166_v10 = vld [vmem:[%s3633_s4 + $0xf0] sm:$0xff]  }
  0x69   : > { %2956 = vmatprep.subr.bf16.mxu0 %v3156_v18  ;;  %2950 = vmatprep.mubr.bf16.mxu0 %v3165_v25  ;;  %v2639_v25 = vld [vmem:[%s3336_s17 + $0x28] sm:$0xf] }
  0x6a   : > { %2854 = vmatprep.mubr.bf16.mxu1 %v2465_v62  ;;  %v2002_v36 = vshrl.u32 %v2639_v25, 16  ;;  %v2005_v37 = vshll.u32 %v2639_v25, 16 }
  0x6b   : > { %2861 = vmatpush3.bf16.msra.mxu1 %v3155_v14  ;;  %v3175_v14 = vld [vmem:[%s3633_s4 + $0x200] sm:$0xff]  }
  0x6c   : > { %2957 = vmatpush3.bf16.msra.mxu0 %v3156_v18  ;;  %2862 = vmatprep.subr.bf16.mxu1 %v3157_v35  ;;  %v2634_v18 = vld [vmem:[%s3336_s17 + $0x14] sm:$0x1]  ;;  %v2004_v47 = vrot.slane %v2002_v36, 4  ;;  %v2007_v48 = vrot.slane %v2005_v37, 5 }
  0x6d   : > { %2958 = vmatprep.subr.bf16.mxu0 %v3158_v41  ;;  %v1969_v24 = vshll.u32 %v2634_v18, 16  ;;  %v3185_v37 = vld [vmem:[%s3633_s4 + $0x230] sm:$0xff]  }
  0x6e   : > { %2855 = vmatmul.mubr.bf16.gmra.mrb[4].mxu1 %v2466_v6  ;;  %v2008_v55 = vor.u32 %v2007_v48, %v2004_v47  ;;  %v2645_v6 = vld [vmem:[%s3336_s17 + $0x40] sm:$0xf] }
  0x6f   : > { %2863 = vmatpush3.bf16.msra.mxu1 %v3157_v35  ;;  %2951 = vmatmul.mubr.bf16.gmra.mrb[4].mxu0 %v3167_v58  ;;  %v1952_v35 = vor.u32 %v1951_v27, %v1948_v26  ;;  %v1971_v46 = vrot.slane %v1969_v24, 5 }
  0x70   : > { %2959 = vmatpush3.bf16.msra.mxu0 %v3158_v41  ;;  %2864 = vmatprep.subr.bf16.mxu1 %v3159_v50  ;;  %v2016_v41 = vshrl.u32 %v2641_v29, 16  ;;  %v2009_v60 = vrot.slane %v2008_v55, 4 }
  0x71   : > { %2960 = vmatprep.subr.bf16.mxu0 %v3160_v61  ;;  %2970 = vmatprep.mubr.bf16.mxu0 %v3172_v4  ;;  %v1972_v63 = vsel %vm3371_vm2, %v1967_v51, %v1971_v46  ;;  %v3186_v46 = vld [vmem:[%s3633_s4 + $0x238] sm:$0xff]  }
  0x72   : > { %2874 = vmatprep.mubr.bf16.mxu1 %v3171_v7  ;;  %v2018_v52 = vrot.slane %v2016_v41, 4  ;;  %v2014_v2 = vsel %vm3371_vm2, %v2009_v60, %v2013_v56  ;;  %v1997_v41 = vshll.u32 %v2638_v32, 16 }
  0x73   : > { %2865 = vmatpush3.bf16.msra.mxu1 %v3159_v50  ;;  %v1953_v50 = vrot.slane %v1952_v35, 4 }
  0x74   : > { %2961 = vmatpush3.bf16.msra.mxu0 %v3160_v61  ;;  %2866 = vmatprep.subr.bf16.mxu1 %v3161_v1  ;;  %v2022_v58 = vor.u32 %v2021_v54, %v2018_v52  ;;  %v3179_v61 = vld [vmem:[%s3346_s23 + $0x30] ss:$8 sps:$4 sm:$0xff]  }
  0x75   : > { %2962 = vmatprep.subr.bf16.mxu0 %v3162_v5  ;;  %v1958_v62 = vsel %vm3371_vm2, %v1953_v50, %v1957_v45  ;;  %v1999_v50 = vrot.slane %v1997_v41, 5 }
  0x76   : > { %v2023_v0 = vrot.slane %v2022_v58, 4  ;;  %v2663_v7 = vcombine.low %v1958_v62, %v1972_v63 }
  0x77   : > { %2867 = vmatpush3.bf16.msra.mxu1 %v3161_v1  ;;  %v3180_v1 = vld [vmem:[%s3282_s28 + $0x38] ss:$8 sps:$4 sm:$0xff]  }
  0x78   : > { %2963 = vmatpush3.bf16.msra.mxu0 %v3162_v5  ;;  %2868 = vmatprep.subr.bf16.mxu1 %v3163_v8  ;;  %v2028_v4 = vsel %vm3371_vm2, %v2023_v0, %v2027_v59  ;;  %v2643_v5 = vld [vmem:[%s3336_s17 + $0x38] sm:$0xf] }
  0x79   : > { %2964 = vmatprep.subr.bf16.mxu0 %v3164_v9 }
  0x7b   : > { %2869 = vmatpush3.bf16.msra.mxu1 %v3163_v8  ;;  %v2635_v8 = vld [vmem:[%s3336_s17 + $0x18] sm:$0xf] }
  0x7c   : > { %2965 = vmatpush3.bf16.msra.mxu0 %v3164_v9  ;;  %2870 = vmatprep.subr.bf16.mxu1 %v3166_v10  ;;  %v2637_v9 = vld [vmem:[%s3336_s17 + $0x20] sm:$0xf]  ;;  %v1974_v16 = vshrl.u32 %v2635_v8, 16  ;;  %v1977_v17 = vshll.u32 %v2635_v8, 16 }
  0x7d   : > { %2966 = vmatprep.subr.bf16.mxu0 %v3168_v11  ;;  %v1988_v18 = vshrl.u32 %v2637_v9, 16  ;;  %v1991_v19 = vshll.u32 %v2637_v9, 16 }
  0x7e   : > { %v1976_v26 = vrot.slane %v1974_v16, 4  ;;  %v1979_v27 = vrot.slane %v1977_v17, 5 }
  0x7f   : > { %2871 = vmatpush3.bf16.msra.mxu1 %v3166_v10  ;;  %v2665_v10 = vcombine.low %v2014_v2, %v2028_v4  ;;  %v1990_v28 = vrot.slane %v1988_v18, 4  ;;  %v1993_v29 = vrot.slane %v1991_v19, 5 }
  0x80   : > { %2967 = vmatpush3.bf16.msra.mxu0 %v3168_v11  ;;  %2872 = vmatprep.subr.bf16.mxu1 %v3169_v12  ;;  %v2030_v11 = vshrl.u32 %v2643_v5, 16  ;;  %v1980_v38 = vor.u32 %v1979_v27, %v1976_v26 }
  0x81   : > { %2968 = vmatprep.subr.bf16.mxu0 %v3170_v13  ;;  %v1994_v40 = vor.u32 %v1993_v29, %v1990_v28 }
  0x82   : > { %v2032_v22 = vrot.slane %v2030_v11, 4  ;;  %v1981_v47 = vrot.slane %v1980_v38, 4 }
  0x83   : > { %2873 = vmatpush3.bf16.msra.mxu1 %v3169_v12  ;;  %v2033_v12 = vshll.u32 %v2643_v5, 16 }
  0x84   : > { %2969 = vmatpush3.bf16.msra.mxu0 %v3170_v13  ;;  %3002 = vmatprep.subr.bf16.mxu1 %v3175_v14  ;;  %v2044_v13 = vshrl.u32 %v2645_v6, 16 }
  0x85   : > { %2978 = vmatprep.subr.bf16.mxu0 %v3175_v14  ;;  %v2035_v23 = vrot.slane %v2033_v12, 5 }
  0x86   : > { %2875 = vmatmul.mubr.bf16.vlgmr.msra.gmra.mrb[0].mxu1 %v3173_v30  ;;  %v2046_v24 = vrot.slane %v2044_v13, 4  ;;  %v2646_v30 = vld [vmem:[%s3336_s17 + $0x44] sm:$0x1] }
  0x87   : > { %2971 = vmatmul.mubr.bf16.vlgmr.msra.gmra.mrb[0].mxu0 %v3174_v34  ;;  %3010 = vmatpush3.bf16.msra.mxu1 %v3175_v14  ;;  %v2036_v33 = vor.u32 %v2035_v23, %v2032_v22  ;;  %v2039_v34 = vshll.u32 %v2644_v21, 16  ;;  %v2053_v36 = vshll.u32 %v2646_v30, 16 }
  0x88   : > { %2979 = vmatpush3.bf16.msra.mxu0 %v3175_v14  ;;  %3003 = vmatprep.subr.bf16.mxu1 %v3176_v39  ;;  %v2047_v14 = vshll.u32 %v2645_v6, 16 }
  0x89   : > { %2980 = vmatprep.subr.bf16.mxu0 %v3176_v39  ;;  %2878 = vmatprep.mubr.bf16.mxu1 %v3177_v44  ;;  %v2037_v42 = vrot.slane %v2036_v33, 4  ;;  %v2041_v43 = vrot.slane %v2039_v34, 5  ;;  %v2055_v45 = vrot.slane %v2053_v36, 5 }
  0x8a   : > { %2974 = vmatprep.mubr.bf16.mxu0 %v3178_v49  ;;  %v2049_v25 = vrot.slane %v2047_v14, 5  ;;  %v1995_v49 = vrot.slane %v1994_v40, 4 }
  0x8b   : > { %3011 = vmatpush3.bf16.msra.mxu1 %v3176_v39  ;;  %v2042_v51 = vsel %vm3371_vm2, %v2037_v42, %v2041_v43 }
  0x8c   : > { %2981 = vmatpush3.bf16.msra.mxu0 %v3176_v39  ;;  %3004 = vmatprep.subr.bf16.mxu1 %v3181_v57  ;;  %v2050_v35 = vor.u32 %v2049_v25, %v2046_v24  ;;  %v1983_v39 = vshll.u32 %v2636_v31, 16  ;;  %v2000_v55 = vsel %vm3371_vm2, %v1995_v49, %v1999_v50 }
  0x8d   : > { %2982 = vmatprep.subr.bf16.mxu0 %v3181_v57 }
  0x8e   : > { %2879 = vmatmul.mubr.bf16.gmra.mrb[4].mxu1 %v3179_v61  ;;  %v2051_v44 = vrot.slane %v2050_v35, 4  ;;  %v1985_v48 = vrot.slane %v1983_v39, 5 }
  0x8f   : > { %2975 = vmatmul.mubr.bf16.gmra.mrb[4].mxu0 %v3180_v1  ;;  %3012 = vmatpush3.bf16.msra.mxu1 %v3181_v57 }
  0x90   : > { %2983 = vmatpush3.bf16.msra.mxu0 %v3181_v57  ;;  %3005 = vmatprep.subr.bf16.mxu1 %v3182_v3  ;;  %v2056_v52 = vsel %vm3371_vm2, %v2051_v44, %v2055_v45  ;;  %v1986_v54 = vsel %vm3371_vm2, %v1981_v47, %v1985_v48 }
  0x91   : > { %2984 = vmatprep.subr.bf16.mxu0 %v3182_v3  ;;  %2994 = vmatprep.mubr.bf16.mxu0 %v2663_v7  ;;  %v2666_v56 = vcombine.low %v2042_v51, %v2056_v52  ;;  %v2664_v57 = vcombine.low %v1986_v54, %v2000_v55 }
  0x92   : > { %2998 = vmatprep.mubr.bf16.mxu1 %v2665_v10 }
  0x93   : > { %3013 = vmatpush3.bf16.msra.mxu1 %v3182_v3 }
  0x94   : > { %2985 = vmatpush3.bf16.msra.mxu0 %v3182_v3  ;;  %3006 = vmatprep.subr.bf16.mxu1 %v3183_v15 }
  0x95   : > { %2986 = vmatprep.subr.bf16.mxu0 %v3183_v15 }
  0x97   : > { %3014 = vmatpush3.bf16.msra.mxu1 %v3183_v15 }
  0x98   : > { %2987 = vmatpush3.bf16.msra.mxu0 %v3183_v15  ;;  %3007 = vmatprep.subr.bf16.mxu1 %v3184_v20 }
  0x99   : > { %2988 = vmatprep.subr.bf16.mxu0 %v3184_v20 }
  0x9b   : > { %3015 = vmatpush3.bf16.msra.mxu1 %v3184_v20 }
  0x9c   : > { %2989 = vmatpush3.bf16.msra.mxu0 %v3184_v20  ;;  %3008 = vmatprep.subr.bf16.mxu1 %v3185_v37 }
  0x9d   : > { %2990 = vmatprep.subr.bf16.mxu0 %v3185_v37 }
  0x9f   : > { %3016 = vmatpush3.bf16.msra.mxu1 %v3185_v37 }
  0xa0   : > { %2991 = vmatpush3.bf16.msra.mxu0 %v3185_v37  ;;  %3009 = vmatprep.subr.bf16.mxu1 %v3186_v46 }
  0xa1   : > { %2992 = vmatprep.subr.bf16.mxu0 %v3186_v46 }
  0xa3   : > { %3017 = vmatpush3.bf16.msra.mxu1 %v3186_v46 }
  0xa4   : > { %2993 = vmatpush3.bf16.msra.mxu0 %v3186_v46 }
  0xa6   : > { %2999 = vmatmul.mubr.bf16.vlgmr.msra.gmra.mrb[8].mxu1 %v2666_v56 }
  0xa7   : > { %2995 = vmatmul.mubr.bf16.vlgmr.msra.gmra.mrb[0].mxu0 %v2664_v57 }
 0x159   : > { %v2876_v58 = vpop.f32.mrb[0].mxu1 }
 0x15a   : > { %v1096_v59 = vpop.f32.mrb[1].mxu1 }
 0x15b   : > { %v2877_v60 = vpop.f32.mrb[2].mxu1 }
 0x15c   : > { %v1099_v61 = vpop.f32.mrb[3].mxu1 }
 0x161   : > { %v2880_v62 = vpop.f32.mrb[4].mxu1 }
 0x162   : > { %v2976_v63 = vpop.f32.mrb[4].mxu0  ;;  %v1112_v0 = vpop.f32.mrb[5].mxu1 }
 0x163   : > { %v3022_v1 = vadd.f32 %v2976_v63, %v2880_v62  ;;  %v1906_v2 = vpop.f32.mrb[5].mxu0  ;;  %v2881_v3 = vpop.f32.mrb[6].mxu1 }
 0x164   : > { %v3024_v53 = vadd.f32 %v1906_v2, %v1112_v0  ;;  %v2977_v4 = vpop.f32.mrb[6].mxu0  ;;  %v1115_v5 = vpop.f32.mrb[7].mxu1 }
 0x165   : > { %v3026_v6 = vadd.f32 %v2977_v4, %v2881_v3  ;;  %v1909_v7 = vpop.f32.mrb[7].mxu0 }
 0x166   : > { %v3028_v8 = vadd.f32 %v1909_v7, %v1115_v5 }
 0x179   : > { %v3000_v9 = vpop.f32.mrb[8].mxu1 }
 0x17a   : > { %v2996_v10 = vpop.f32.mrb[0].mxu0  ;;  %v3023_v11 = vadd.f32 %v3022_v1, %v3000_v9  ;;  %v2188_v12 = vpop.f32.mrb[9].mxu1 }
 0x17b   : > { %v3018_v13 = vadd.f32 %v2996_v10, %v2876_v58  ;;  %v2172_v14 = vpop.f32.mrb[1].mxu0  ;;  %v3025_v15 = vadd.f32 %v3024_v53, %v2188_v12  ;;  %v3001_v16 = vpop.f32.mrb[10].mxu1 }
 0x17c   : > { %2217 = vst [vmem:[%s349_s11 + $0x30] sm:$0xff] %v3023_v11  ;;  %v3019_v17 = vadd.f32 %v2172_v14, %v1096_v59  ;;  %v2997_v18 = vpop.f32.mrb[2].mxu0  ;;  %v3027_v19 = vadd.f32 %v3026_v6, %v3001_v16  ;;  %v2191_v20 = vpop.f32.mrb[11].mxu1  ;;  %v2239_v40 = vmul.f32 %v3023_v11, %v3023_v11 }
 0x17d   : > { %2213 = vst [vmem:[%s349_s11 + $0x10] sm:$0xff] %v3018_v13  ;;  %2215 = vst [vmem:[%s349_s11 + $0x20] sm:$0xff] %v3025_v15  ;;  %v3020_v21 = vadd.f32 %v2997_v18, %v2877_v60  ;;  %v2175_v22 = vpop.f32.mrb[3].mxu0  ;;  %v3029_v23 = vadd.f32 %v3028_v8, %v2191_v20  ;;  %v2235_v28 = vmul.f32 %v3018_v13, %v3018_v13 }
 0x17e   : > { %2211 = vst [vmem:[%s349_s11] sm:$0xff] %v3019_v17  ;;  %2218 = vst [vmem:[%s349_s11 + $0x38] sm:$0xff] %v3027_v19  ;;  %v3021_v24 = vadd.f32 %v2175_v22, %v1099_v61  ;;  %v2233_v25 = vmul.f32 %v3019_v17, %v3019_v17  ;;  %v2237_v34 = vmul.f32 %v3025_v15, %v3025_v15 }
 0x17f   : > { %2214 = vst [vmem:[%s349_s11 + $0x18] sm:$0xff] %v3020_v21  ;;  %2216 = vst [vmem:[%s349_s11 + $0x28] sm:$0xff] %v3029_v23  ;;  %v2236_v31 = vmul.f32 %v3020_v21, %v3020_v21  ;;  %v2238_v38 = vmul.f32 %v3029_v23, %v3029_v23  ;;  %v2240_v43 = vmul.f32 %v3027_v19, %v3027_v19 }
 0x180   : > { %2212 = vst [vmem:[%s349_s11 + $0x8] sm:$0xff] %v3021_v24  ;;  %v2219_v26 = vadd.f32 %v3021_v24, %v3019_v17  ;;  %v2234_v27 = vmul.f32 %v3021_v24, %v3021_v24 }
 0x182   : > { %v2220_v29 = vadd.f32 %v3018_v13, %v2219_v26  ;;  %v2241_v30 = vadd.f32 %v2234_v27, %v2233_v25 }
 0x184   : > { %v2242_v32 = vadd.f32 %v2241_v30, %v2235_v28  ;;  %v2221_v33 = vadd.f32 %v3020_v21, %v2220_v29 }
 0x186   : > { %v2222_v35 = vadd.f32 %v3025_v15, %v2221_v33  ;;  %v2243_v36 = vadd.f32 %v2242_v32, %v2236_v31 }
 0x188   : > { %v2223_v37 = vadd.f32 %v3029_v23, %v2222_v35  ;;  %v2244_v39 = vadd.f32 %v2243_v36, %v2237_v34 }
 0x18a   : > { %v2224_v41 = vadd.f32 %v3023_v11, %v2223_v37  ;;  %v2245_v42 = vadd.f32 %v2244_v39, %v2238_v38 }
 0x18c   : > { %v2225_v44 = vadd.f32 %v3027_v19, %v2224_v41  ;;  %v2246_v45 = vadd.f32 %v2245_v42, %v2239_v40 }
 0x18e   : > { %v2226_v46 = vrot.slane %v2225_v44, 4  ;;  %v2247_v47 = vadd.f32 %v2246_v45, %v2240_v43 }
 0x190   : > { %v2227_v48 = vadd.f32 %v2226_v46, %v2225_v44  ;;  %v2248_v49 = vrot.slane %v2247_v47, 4 }
 0x192   : > { %v2228_v50 = vrot.slane %v2227_v48, 2  ;;  %v2249_v51 = vadd.f32 %v2248_v49, %v2247_v47 }
 0x194   : > { %v2229_v52 = vadd.f32 %v2228_v50, %v2227_v48  ;;  %v2250_v54 = vrot.slane %v2249_v51, 2 }
 0x196   : > { %v2230_v55 = vrot.slane %v2229_v52, 1  ;;  %v2251_v56 = vadd.f32 %v2250_v54, %v2249_v51 }
 0x198   : > { %v2231_v57 = vadd.f32 %v2230_v55, %v2229_v52  ;;  %v2252_v58 = vrot.slane %v2251_v56, 1 }
 0x19a   : > { %2232 = vst [vmem:[%s352_s14] sm:$0x1] %v2231_v57  ;;  %v2253_v59 = vadd.f32 %v2252_v58, %v2251_v56 }
 0x19c   : > { %2254 = vst [vmem:[%s355_s18] sm:$0x1] %v2253_v59 }
 0x19d PF: > { %s18_s24 = sadd.s32 1, %s3193_s24  }
 0x19e   : > { %p15_p4 = scmp.ge.s32.totalorder %s18_s24, 4  }
 0x1a0   :  { %17 = sbr.rel (!%p15_p4) target bundleno = 1 (0x1), region = 113 }

</bundles_post_ra>
